<compile_context>
chip_gen: v7x
topology: tpu7x:2x2x1
jax: 0.10.0
libtpu: 0.0.40
codegen_flags: <defaults>
</compile_context>

<pallas_src>
import math
import functools

import jax
import jax.numpy as jnp
from jax.experimental import pallas as pl
from jax.experimental.pallas import tpu as pltpu


NEG_INF = -10000.0  # matches reference masked_fill(mask == 0, -10000)


def _round_up(x, m):
    return ((x + m - 1) // m) * m


# ----------------------------------------------------------------------------
# Kernel 1: tiled matmul + bias (+ ReLU) epilogue
# ----------------------------------------------------------------------------
def _matmul_kernel(x_ref, w_ref, b_ref, o_ref, acc_ref, *, activation):
    @pl.when(pl.program_id(2) == 0)
    def _():
        acc_ref[...] = jnp.zeros_like(acc_ref)

    acc_ref[...] += jnp.dot(x_ref[...], w_ref[...],
                            preferred_element_type=jnp.float32)

    @pl.when(pl.program_id(2) == pl.num_programs(2) - 1)
    def _():
        y = acc_ref[...] + b_ref[...]
        if activation == "relu":
            y = jnp.maximum(y, 0.0)
        o_ref[...] = y.astype(o_ref.dtype)


def linear(x2d, w, b, activation=None, out_dtype=jnp.float32,
           tm=256, tn=256, tk=512):
    """x2d: [M, K], w: [K, N] (bf16 MXU operands), b: [1, N] f32 -> [M, N]."""
    M, K = x2d.shape
    Kw, N = w.shape
    assert K == Kw
    x2d = x2d.astype(jnp.bfloat16)
    w = w.astype(jnp.bfloat16)
    b = b.astype(jnp.float32)

    # MXU-aligned tiles when the dim is large (pad with zeros so tiles divide),
    # full-extent blocks when small (legal for any size).
    if M <= tm:
        tm_, Mp = M, M
    else:
        tm_, Mp = tm, _round_up(M, tm)
    if N <= tn:
        tn_, Np = N, N
    else:
        tn_, Np = tn, _round_up(N, tn)
    if K <= tk:
        tk_, Kp = K, K
    else:
        tk_, Kp = tk, _round_up(K, tk)

    if (Mp, Kp) != (M, K):
        x2d = jnp.pad(x2d, ((0, Mp - M), (0, Kp - K)))
    if (Kp, Np) != (K, N):
        w = jnp.pad(w, ((0, Kp - K), (0, Np - N)))
    if Np != N:
        b = jnp.pad(b, ((0, 0), (0, Np - N)))

    out = pl.pallas_call(
        functools.partial(_matmul_kernel, activation=activation),
        out_shape=jax.ShapeDtypeStruct((Mp, Np), out_dtype),
        grid=(Mp // tm_, Np // tn_, Kp // tk_),
        in_specs=[
            pl.BlockSpec((tm_, tk_), lambda i, j, k: (i, k)),
            pl.BlockSpec((tk_, tn_), lambda i, j, k: (k, j)),
            pl.BlockSpec((1, tn_), lambda i, j, k: (0, j)),
        ],
        out_specs=pl.BlockSpec((tm_, tn_), lambda i, j, k: (i, j)),
        scratch_shapes=[pltpu.VMEM((tm_, tn_), jnp.float32)],
        compiler_params=pltpu.CompilerParams(
            dimension_semantics=("parallel", "parallel", "arbitrary")),
    )(x2d, w, b)

    if (Mp, Np) != (M, N):
        out = out[:M, :N]
    return out


# ----------------------------------------------------------------------------
# Kernel 2: fused scaled-dot-product attention, one batch element per step,
#           all heads batched in one einsum, mask built in-kernel.
# ----------------------------------------------------------------------------
def _attn_kernel(q_ref, k_ref, v_ref, qv_ref, kv_ref, o_ref, *, causal):
    H, Sq, Dh = q_ref.shape
    Sk = k_ref.shape[1]
    scale = 1.0 / math.sqrt(Dh)

    # Pre-scale q (Sq*Dh elems) instead of the (Sq,Sk) score tensor.
    q = (q_ref[...].astype(jnp.float32) * scale).astype(jnp.bfloat16)
    k = k_ref[...]
    v = v_ref[...]

    # NT matmul via dot_general (no in-kernel transpose of k), f32 accumulate.
    s = jnp.einsum("hqd,hkd->hqk", q, k,
                   preferred_element_type=jnp.float32)          # (H, Sq, Sk)

    # Pad mask from per-token validity vectors; causal mask from iota.
    mask = (qv_ref[...] > 0.5) & (kv_ref[...] > 0.5)             # (Sq, Sk)
    if causal:
        row = jax.lax.broadcasted_iota(jnp.int32, (Sq, Sk), 0)
        col = jax.lax.broadcasted_iota(jnp.int32, (Sq, Sk), 1)
        mask = jnp.logical_and(mask, row >= col)
    s = jnp.where(mask[None, :, :], s, NEG_INF)

    # Softmax in f32 (v5e has no bf16 VPU/EUP); reciprocal goes to the EUP.
    s = s - jnp.max(s, axis=-1, keepdims=True)
    p = jnp.exp(s)
    p = p * pl.reciprocal(jnp.sum(p, axis=-1, keepdims=True), approx=True)

    o = jnp.einsum("hqk,hkd->hqd", p.astype(jnp.bfloat16), v,
                   preferred_element_type=jnp.float32)
    o_ref[...] = o.astype(o_ref.dtype)


def sdp_attention(q, k, v, q_valid, k_valid, causal):
    """q: [B,H,Sq,Dh], k/v: [B,H,Sk,Dh] (bf16);
       q_valid: [B,Sq,1] f32; k_valid: [B,1,Sk] f32 -> [B,H,Sq,Dh] bf16."""
    B, H, Sq, Dh = q.shape
    Sk = k.shape[2]
    # TODO(synk): for long sequences tile Sk flash-style (online softmax with
    # m/l/acc VMEM scratch, "arbitrary" innermost KV axis) to bound VMEM.
    return pl.pallas_call(
        functools.partial(_attn_kernel, causal=causal),
        out_shape=jax.ShapeDtypeStruct((B, H, Sq, Dh), jnp.bfloat16),
        grid=(B,),
        in_specs=[
            pl.BlockSpec((None, H, Sq, Dh), lambda b: (b, 0, 0, 0)),
            pl.BlockSpec((None, H, Sk, Dh), lambda b: (b, 0, 0, 0)),
            pl.BlockSpec((None, H, Sk, Dh), lambda b: (b, 0, 0, 0)),
            pl.BlockSpec((None, Sq, 1), lambda b: (b, 0, 0)),
            pl.BlockSpec((None, 1, Sk), lambda b: (b, 0, 0)),
        ],
        out_specs=pl.BlockSpec((None, H, Sq, Dh), lambda b: (b, 0, 0, 0)),
        compiler_params=pltpu.CompilerParams(dimension_semantics=("parallel",)),
    )(q.astype(jnp.bfloat16), k.astype(jnp.bfloat16), v.astype(jnp.bfloat16),
      q_valid, k_valid)


# ----------------------------------------------------------------------------
# Kernel 3: fused residual add + LayerNorm, row-tiled
# ----------------------------------------------------------------------------
def _add_ln_kernel(x_ref, r_ref, g_ref, b_ref, o_ref, *, eps):
    x = x_ref[...].astype(jnp.float32) + r_ref[...].astype(jnp.float32)
    mean = jnp.mean(x, axis=-1, keepdims=True)
    xc = x - mean
    var = jnp.mean(xc * xc, axis=-1, keepdims=True)   # biased variance
    y = xc * jax.lax.rsqrt(var + eps)
    o_ref[...] = (y * g_ref[...] + b_ref[...]).astype(o_ref.dtype)


def add_layernorm(x, res, gamma, beta, eps=1e-12, tm=512):
    """LayerNorm(x + res) over last dim. x, res: [M, D]; gamma, beta: [1, D]."""
    M, D = x.shape
    if M <= tm:
        tm_, Mp = M, M
    else:
        tm_, Mp = tm, _round_up(M, tm)
    if Mp != M:
        x = jnp.pad(x, ((0, Mp - M), (0, 0)))
        res = jnp.pad(res, ((0, Mp - M), (0, 0)))
    out = pl.pallas_call(
        functools.partial(_add_ln_kernel, eps=eps),
        out_shape=jax.ShapeDtypeStruct((Mp, D), jnp.float32),
        grid=(Mp // tm_,),
        in_specs=[
            pl.BlockSpec((tm_, D), lambda i: (i, 0)),
            pl.BlockSpec((tm_, D), lambda i: (i, 0)),
            pl.BlockSpec((1, D), lambda i: (0, 0)),
            pl.BlockSpec((1, D), lambda i: (0, 0)),
        ],
        out_specs=pl.BlockSpec((tm_, D), lambda i: (i, 0)),
        compiler_params=pltpu.CompilerParams(dimension_semantics=("parallel",)),
    )(x, res, gamma, beta)
    return out[:M] if Mp != M else out


# ----------------------------------------------------------------------------
# Model glue (plain JAX): embeddings, PE, head split/merge, layer wiring
# ----------------------------------------------------------------------------
def sinusoid_pe(max_len, d_model):
    pos = jnp.arange(max_len, dtype=jnp.float32)[:, None]
    i2 = jnp.arange(0, d_model, 2, dtype=jnp.float32)
    div = jnp.power(10000.0, i2 / d_model)
    pe = jnp.zeros((max_len, d_model), jnp.float32)
    pe = pe.at[:, 0::2].set(jnp.sin(pos / div))
    pe = pe.at[:, 1::2].set(jnp.cos(pos / div))
    return pe


def residual_ln(x, res, p):
    B, S, D = x.shape
    return add_layernorm(x.reshape(B * S, D), res.reshape(B * S, D),
                         p["g"], p["b"]).reshape(B, S, D)


def mha_self(x, valid_q1, valid_1k, p, n_head, causal):
    """Self-attention with fused Q|K|V projection (single matmul)."""
    B, S, D = x.shape
    Dh = D // n_head
    qkv = linear(x.reshape(B * S, D), p["wqkv"], p["bqkv"],
                 out_dtype=jnp.bfloat16)                       # [B*S, 3D]
    qkv = qkv.reshape(B, S, 3, n_head, Dh).transpose(2, 0, 3, 1, 4)
    o = sdp_attention(qkv[0], qkv[1], qkv[2], valid_q1, valid_1k, causal)
    o = o.transpose(0, 2, 1, 3).reshape(B * S, D)
    return linear(o, p["wo"], p["bo"]).reshape(B, S, D)


def mha_cross(x_q, x_kv, valid_q1, valid_1k, p, n_head):
    """Cross-attention with fused K|V projection of the encoder memory."""
    B, Sq, D = x_q.shape
    Sk = x_kv.shape[1]
    Dh = D // n_head
    q = linear(x_q.reshape(B * Sq, D), p["wq"], p["bq"], out_dtype=jnp.bfloat16)
    q = q.reshape(B, Sq, n_head, Dh).transpose(0, 2, 1, 3)
    kv = linear(x_kv.reshape(B * Sk, D), p["wkv"], p["bkv"], out_dtype=jnp.bfloat16)
    kv = kv.reshape(B, Sk, 2, n_head, Dh).transpose(2, 0, 3, 1, 4)
    o = sdp_attention(q, kv[0], kv[1], valid_q1, valid_1k, causal=False)
    o = o.transpose(0, 2, 1, 3).reshape(B * Sq, D)
    return linear(o, p["wo"], p["bo"]).reshape(B, Sq, D)


def ffn(x, p):
    B, S, D = x.shape
    h = linear(x.reshape(B * S, D), p["w1"], p["b1"], activation="relu",
               out_dtype=jnp.bfloat16)
    o = linear(h, p["w2"], p["b2"])
    return o.reshape(B, S, D)


def encoder_forward(params, src, src_valid, n_head):
    B, S = src.shape
    x = params["enc_emb"][src] + params["pe"][:S][None, :, :]
    # TODO(synk): dropout is identity at inference time; omitted.
    vq = src_valid.reshape(B, S, 1)
    vk = src_valid.reshape(B, 1, S)
    for layer in params["enc_layers"]:
        x = residual_ln(mha_self(x, vq, vk, layer["attn"], n_head, causal=False),
                        x, layer["ln1"])
        x = residual_ln(ffn(x, layer["ffn"]), x, layer["ln2"])
    return x


def decoder_forward(params, trg, enc_src, trg_valid, src_valid, n_head):
    B, S = trg.shape
    Sk = enc_src.shape[1]
    x = params["dec_emb"][trg] + params["pe"][:S][None, :, :]
    tq = trg_valid.reshape(B, S, 1)
    tk = trg_valid.reshape(B, 1, S)
    sk = src_valid.reshape(B, 1, Sk)
    for layer in params["dec_layers"]:
        x = residual_ln(mha_self(x, tq, tk, layer["self_attn"], n_head, causal=True),
                        x, layer["ln1"])
        x = residual_ln(mha_cross(x, enc_src, tq, sk, layer["cross_attn"], n_head),
                        x, layer["ln2"])
        x = residual_ln(ffn(x, layer["ffn"]), x, layer["ln3"])
    D = x.shape[-1]
    V = params["out_w"].shape[1]
    logits = linear(x.reshape(B * S, D), params["out_w"], params["out_b"])
    return logits.reshape(B, S, V)


def transformer_forward(params, source, target, pad_idx, n_head):
    # Per-token validity vectors; the O(S^2) pad/causal masks are generated
    # inside the attention kernel (no f32 [B,1,S,S] mask in HBM).
    src_valid = (source != pad_idx).astype(jnp.float32)   # [B, Ss]
    trg_valid = (target != pad_idx).astype(jnp.float32)   # [B, St]
    enc_src = encoder_forward(params, source, src_valid, n_head)
    return decoder_forward(params, target, enc_src, trg_valid, src_valid, n_head)


# ----------------------------------------------------------------------------
# Deterministic parameter init (weights stored in bf16 for the MXU)
# ----------------------------------------------------------------------------
def init_params(key, enc_vocab, dec_vocab, d_model, ff_dim, n_layers, max_len):
    keys = iter(jax.random.split(key, 512))

    def w(din, dout):
        return (0.02 * jax.random.normal(next(keys), (din, dout),
                                         jnp.float32)).astype(jnp.bfloat16)

    def b(dout):
        return jnp.zeros((1, dout), jnp.float32)

    def ln():
        return {"g": jnp.ones((1, d_model), jnp.float32),
                "b": jnp.zeros((1, d_model), jnp.float32)}

    def self_attn():
        return {"wqkv": w(d_model, 3 * d_model), "bqkv": b(3 * d_model),
                "wo": w(d_model, d_model), "bo": b(d_model)}

    def cross_attn():
        return {"wq": w(d_model, d_model), "bq": b(d_model),
                "wkv": w(d_model, 2 * d_model), "bkv": b(2 * d_model),
                "wo": w(d_model, d_model), "bo": b(d_model)}

    def ffn_p():
        return {"w1": w(d_model, ff_dim), "b1": b(ff_dim),
                "w2": w(ff_dim, d_model), "b2": b(d_model)}

    return {
        "enc_emb": 0.02 * jax.random.normal(next(keys), (enc_vocab, d_model), jnp.float32),
        "dec_emb": 0.02 * jax.random.normal(next(keys), (dec_vocab, d_model), jnp.float32),
        "pe": sinusoid_pe(max_len, d_model),
        "enc_layers": [{"attn": self_attn(), "ln1": ln(),
                        "ffn": ffn_p(), "ln2": ln()} for _ in range(n_layers)],
        "dec_layers": [{"self_attn": self_attn(), "ln1": ln(),
                        "cross_attn": cross_attn(), "ln2": ln(),
                        "ffn": ffn_p(), "ln3": ln()} for _ in range(n_layers)],
        "out_w": w(d_model, dec_vocab),
        "out_b": b(dec_vocab),
    }


# ----------------------------------------------------------------------------
if __name__ == "__main__":
    B, S = 2, 8
    d_model, n_head, ff_dim, n_layers = 32, 4, 64, 2
    max_length = 16
    enc_vocab, dec_vocab = 50, 60
    pad_idx = 0

    key = jax.random.PRNGKey(0)
    k_p, k_src, k_trg = jax.random.split(key, 3)

    params = init_params(k_p, enc_vocab, dec_vocab, d_model, ff_dim, n_layers, max_length)

    source = jax.random.randint(k_src, (B, S), 2, enc_vocab, dtype=jnp.int32)
    target = jax.random.randint(k_trg, (B, S), 2, dec_vocab, dtype=jnp.int32)
    # introduce padding to exercise the pad masks
    source = source.at[:, -2:].set(pad_idx)
    target = target.at[:, -1:].set(pad_idx)

    fwd = jax.jit(functools.partial(transformer_forward, pad_idx=pad_idx, n_head=n_head))
    out = fwd(params, source, target)
    out = jax.block_until_ready(out)

    assert out.shape == (B, S, dec_vocab)
    assert bool(jnp.all(jnp.isfinite(out)))
    print("KERNEL_OK")
</pallas_src>

<mosaic_0001>
module attributes {stable_mosaic.version = 11 : i64} {
  func.func @_matmul_kernel(%arg0: i32, %arg1: i32, %arg2: i32, %arg3: memref<16x32xbf16, #tpu.memory_space<vmem>>, %arg4: memref<32x96xbf16, #tpu.memory_space<vmem>>, %arg5: memref<1x96xf32, #tpu.memory_space<vmem>>, %arg6: memref<16x96xbf16, #tpu.memory_space<vmem>>, %arg7: memref<16x96xf32, #tpu.memory_space<vmem>>) attributes {dimension_semantics = [#tpu.dimension_semantics<parallel>, #tpu.dimension_semantics<parallel>, #tpu.dimension_semantics<arbitrary>], iteration_bounds = array<i64: 1, 1, 1>, scalar_prefetch = 0 : i64, scratch_operands = 1 : i64, tpu.core_type = #tpu.core_type<tc>, window_params = [{transform_indices = @transform_0, window_bounds = array<i64: 16, 32>}, {transform_indices = @transform_1, window_bounds = array<i64: 32, 96>}, {transform_indices = @transform_2, window_bounds = array<i64: 1, 96>}, {transform_indices = @transform_3, window_bounds = array<i64: 16, 96>}]} {
    %c0_i32 = arith.constant 0 : i32
    %0 = arith.cmpi eq, %arg2, %c0_i32 : i32
    %1 = arith.extui %0 : i1 to i32
    %c0_i32_0 = arith.constant 0 : i32
    %2 = arith.cmpi ne, %1, %c0_i32_0 : i32
    scf.if %2 {
      %cst_10 = arith.constant 0.000000e+00 : f32
      %12 = vector.broadcast %cst_10 : f32 to vector<16x96xf32>
      %c0_11 = arith.constant 0 : index
      %c0_12 = arith.constant 0 : index
      %13 = vector.load %arg7[%c0_11, %c0_12] : memref<16x96xf32, #tpu.memory_space<vmem>>, vector<16x96xf32>
      tpu.vector_store %arg7[%c0_11, %c0_12], %12 {strides = array<i32>} : memref<16x96xf32, #tpu.memory_space<vmem>>, vector<16x96xf32>,
    } else {
    }
    %c0 = arith.constant 0 : index
    %c0_1 = arith.constant 0 : index
    %3 = vector.load %arg7[%c0, %c0_1] : memref<16x96xf32, #tpu.memory_space<vmem>>, vector<16x96xf32>
    %c0_2 = arith.constant 0 : index
    %c0_3 = arith.constant 0 : index
    %4 = vector.load %arg3[%c0_2, %c0_3] : memref<16x32xbf16, #tpu.memory_space<vmem>>, vector<16x32xbf16>
    %c0_4 = arith.constant 0 : index
    %c0_5 = arith.constant 0 : index
    %5 = vector.load %arg4[%c0_4, %c0_5] : memref<32x96xbf16, #tpu.memory_space<vmem>>, vector<32x96xbf16>
    %cst = arith.constant dense<0.000000e+00> : vector<16x96xf32>
    %6 = tpu.matmul %4, %5, %cst {dimension_numbers = #tpu.dot_dimension_numbers<[1], [0], [0], [1], [0, 0, 1, 1], [], []>} : vector<16x32xbf16>, vector<32x96xbf16>, vector<16x96xf32> -> vector<16x96xf32>
    %7 = arith.addf %3, %6 : vector<16x96xf32>
    %c0_6 = arith.constant 0 : index
    %c0_7 = arith.constant 0 : index
    %8 = vector.load %arg7[%c0_6, %c0_7] : memref<16x96xf32, #tpu.memory_space<vmem>>, vector<16x96xf32>
    tpu.vector_store %arg7[%c0_6, %c0_7], %7 {strides = array<i32>} : memref<16x96xf32, #tpu.memory_space<vmem>>, vector<16x96xf32>,
    %c0_i32_8 = arith.constant 0 : i32
    %9 = arith.cmpi eq, %arg2, %c0_i32_8 : i32
    %10 = arith.extui %9 : i1 to i32
    %c0_i32_9 = arith.constant 0 : i32
    %11 = arith.cmpi ne, %10, %c0_i32_9 : i32
    scf.if %11 {
      %c0_10 = arith.constant 0 : index
      %c0_11 = arith.constant 0 : index
      %12 = vector.load %arg7[%c0_10, %c0_11] : memref<16x96xf32, #tpu.memory_space<vmem>>, vector<16x96xf32>
      %c0_12 = arith.constant 0 : index
      %c0_13 = arith.constant 0 : index
      %13 = vector.load %arg5[%c0_12, %c0_13] : memref<1x96xf32, #tpu.memory_space<vmem>>, vector<1x96xf32>
      %14 = vector.broadcast %13 : vector<1x96xf32> to vector<16x96xf32>
      %15 = arith.addf %12, %14 : vector<16x96xf32>
      %16 = arith.truncf %15 : vector<16x96xf32> to vector<16x96xbf16>
      %c0_14 = arith.constant 0 : index
      %c0_15 = arith.constant 0 : index
      %17 = vector.load %arg6[%c0_14, %c0_15] : memref<16x96xbf16, #tpu.memory_space<vmem>>, vector<16x96xbf16>
      tpu.vector_store %arg6[%c0_14, %c0_15], %16 {strides = array<i32>} : memref<16x96xbf16, #tpu.memory_space<vmem>>, vector<16x96xbf16>,
    } else {
    }
    return
  }
  func.func @transform_0(%arg0: i32, %arg1: i32, %arg2: i32) -> (i32, i32) {
    %c0_i32 = arith.constant 0 : i32
    return %arg0, %arg2 : i32, i32
  }
  func.func @transform_1(%arg0: i32, %arg1: i32, %arg2: i32) -> (i32, i32) {
    %c0_i32 = arith.constant 0 : i32
    return %arg2, %arg1 : i32, i32
  }
  func.func @transform_2(%arg0: i32, %arg1: i32, %arg2: i32) -> (i32, i32) {
    %c0_i32 = arith.constant 0 : i32
    %c0_i32_0 = arith.constant 0 : i32
    return %c0_i32, %arg1 : i32, i32
  }
  func.func @transform_3(%arg0: i32, %arg1: i32, %arg2: i32) -> (i32, i32) {
    %c0_i32 = arith.constant 0 : i32
    return %arg0, %arg1 : i32, i32
  }
}

module attributes {stable_mosaic.version = 11 : i64} {
  func.func @_attn_kernel(%arg0: i32, %arg1: memref<1x4x8x8xbf16, #tpu.memory_space<vmem>>, %arg2: memref<1x4x8x8xbf16, #tpu.memory_space<vmem>>, %arg3: memref<1x4x8x8xbf16, #tpu.memory_space<vmem>>, %arg4: memref<1x8x1xf32, #tpu.memory_space<vmem>>, %arg5: memref<1x1x8xf32, #tpu.memory_space<vmem>>, %arg6: memref<1x4x8x8xbf16, #tpu.memory_space<vmem>>) attributes {dimension_semantics = [#tpu.dimension_semantics<parallel>], iteration_bounds = array<i64: 2>, scalar_prefetch = 0 : i64, scratch_operands = 0 : i64, tpu.core_type = #tpu.core_type<tc>, window_params = [{transform_indices = @transform_0, window_bounds = array<i64: 1, 4, 8, 8>}, {transform_indices = @transform_1, window_bounds = array<i64: 1, 4, 8, 8>}, {transform_indices = @transform_2, window_bounds = array<i64: 1, 4, 8, 8>}, {transform_indices = @transform_3, window_bounds = array<i64: 1, 8, 1>}, {transform_indices = @transform_4, window_bounds = array<i64: 1, 1, 8>}, {transform_indices = @transform_5, window_bounds = array<i64: 1, 4, 8, 8>}]} {
    %c0 = arith.constant 0 : index
    %c0_0 = arith.constant 0 : index
    %c0_1 = arith.constant 0 : index
    %c0_2 = arith.constant 0 : index
    %0 = vector.load %arg1[%c0, %c0_0, %c0_1, %c0_2] : memref<1x4x8x8xbf16, #tpu.memory_space<vmem>>, vector<1x4x8x8xbf16>
    %1 = vector.shape_cast %0 : vector<1x4x8x8xbf16> to vector<4x8x8xbf16>
    %2 = arith.extf %1 : vector<4x8x8xbf16> to vector<4x8x8xf32>
    %cst = arith.constant 0.353553385 : f32
    %3 = vector.broadcast %cst : f32 to vector<4x8x8xf32>
    %4 = arith.mulf %2, %3 : vector<4x8x8xf32>
    %5 = arith.truncf %4 : vector<4x8x8xf32> to vector<4x8x8xbf16>
    %c0_3 = arith.constant 0 : index
    %c0_4 = arith.constant 0 : index
    %c0_5 = arith.constant 0 : index
    %c0_6 = arith.constant 0 : index
    %6 = vector.load %arg2[%c0_3, %c0_4, %c0_5, %c0_6] : memref<1x4x8x8xbf16, #tpu.memory_space<vmem>>, vector<1x4x8x8xbf16>
    %7 = vector.shape_cast %6 : vector<1x4x8x8xbf16> to vector<4x8x8xbf16>
    %c0_7 = arith.constant 0 : index
    %c0_8 = arith.constant 0 : index
    %c0_9 = arith.constant 0 : index
    %c0_10 = arith.constant 0 : index
    %8 = vector.load %arg3[%c0_7, %c0_8, %c0_9, %c0_10] : memref<1x4x8x8xbf16, #tpu.memory_space<vmem>>, vector<1x4x8x8xbf16>
    %9 = vector.shape_cast %8 : vector<1x4x8x8xbf16> to vector<4x8x8xbf16>
    "tpu.trace_start"() <{level = 10 : i32, message = "hqd,hkd->hqk"}> : () -> ()
    %cst_11 = arith.constant dense<0.000000e+00> : vector<4x8x8xf32>
    %10 = tpu.matmul %5, %7, %cst_11 {dimension_numbers = #tpu.dot_dimension_numbers<[2], [2], [1], [1], [0, 0, 0, 1, 1, 1], [0], [0]>} : vector<4x8x8xbf16>, vector<4x8x8xbf16>, vector<4x8x8xf32> -> vector<4x8x8xf32>
    "tpu.trace_stop"() : () -> ()
    %c0_12 = arith.constant 0 : index
    %c0_13 = arith.constant 0 : index
    %c0_14 = arith.constant 0 : index
    %11 = vector.load %arg4[%c0_12, %c0_13, %c0_14] : memref<1x8x1xf32, #tpu.memory_space<vmem>>, vector<1x8x1xf32>
    %12 = vector.shape_cast %11 : vector<1x8x1xf32> to vector<8x1xf32>
    %cst_15 = arith.constant 5.000000e-01 : f32
    %13 = vector.broadcast %cst_15 : f32 to vector<8x1xf32>
    %14 = arith.cmpf ogt, %12, %13 : vector<8x1xf32>
    %c0_16 = arith.constant 0 : index
    %c0_17 = arith.constant 0 : index
    %c0_18 = arith.constant 0 : index
    %15 = vector.load %arg5[%c0_16, %c0_17, %c0_18] : memref<1x1x8xf32, #tpu.memory_space<vmem>>, vector<1x1x8xf32>
    %16 = vector.shape_cast %15 : vector<1x1x8xf32> to vector<1x8xf32>
    %cst_19 = arith.constant 5.000000e-01 : f32
    %17 = vector.broadcast %cst_19 : f32 to vector<1x8xf32>
    %18 = arith.cmpf ogt, %16, %17 : vector<1x8xf32>
    %19 = vector.broadcast %14 : vector<8x1xi1> to vector<8x8xi1>
    %20 = vector.broadcast %18 : vector<1x8xi1> to vector<8x8xi1>
    %21 = arith.andi %19, %20 : vector<8x8xi1>
    %22 = vector.shape_cast %21 : vector<8x8xi1> to vector<1x8x8xi1>
    %cst_20 = arith.constant -1.000000e+04 : f32
    %23 = vector.shape_cast %22 : vector<1x8x8xi1> to vector<1x8x8xi1>
    %24 = vector.broadcast %23 : vector<1x8x8xi1> to vector<4x8x8xi1>
    %25 = vector.broadcast %cst_20 : f32 to vector<4x8x8xf32>
    %26 = arith.select %24, %10, %25 : vector<4x8x8xi1>, vector<4x8x8xf32>
    %cst_21 = arith.constant dense<0xFF800000> : vector<4x8xf32>
    %27 = vector.multi_reduction <maximumf>, %26, %cst_21 [2] : vector<4x8x8xf32> to vector<4x8xf32>
    %28 = vector.shape_cast %27 : vector<4x8xf32> to vector<4x8x1xf32>
    %29 = vector.broadcast %28 : vector<4x8x1xf32> to vector<4x8x8xf32>
    %30 = arith.subf %26, %29 : vector<4x8x8xf32>
    %31 = math.exp %30 : vector<4x8x8xf32>
    %cst_22 = arith.constant dense<0.000000e+00> : vector<4x8xf32>
    %32 = vector.multi_reduction <add>, %31, %cst_22 [2] : vector<4x8x8xf32> to vector<4x8xf32>
    %33 = vector.shape_cast %32 : vector<4x8xf32> to vector<4x8x1xf32>
    %34 = tpu.reciprocal %33 {approx = true} : vector<4x8x1xf32> -> vector<4x8x1xf32>
    %35 = vector.broadcast %34 : vector<4x8x1xf32> to vector<4x8x8xf32>
    %36 = arith.mulf %31, %35 : vector<4x8x8xf32>
    %37 = arith.truncf %36 : vector<4x8x8xf32> to vector<4x8x8xbf16>
    "tpu.trace_start"() <{level = 10 : i32, message = "hqk,hkd->hqd"}> : () -> ()
    %cst_23 = arith.constant dense<0.000000e+00> : vector<4x8x8xf32>
    %38 = tpu.matmul %37, %9, %cst_23 {dimension_numbers = #tpu.dot_dimension_numbers<[2], [1], [1], [2], [0, 0, 0, 1, 1, 2], [0], [0]>} : vector<4x8x8xbf16>, vector<4x8x8xbf16>, vector<4x8x8xf32> -> vector<4x8x8xf32>
    "tpu.trace_stop"() : () -> ()
    %39 = arith.truncf %38 : vector<4x8x8xf32> to vector<4x8x8xbf16>
    %c0_24 = arith.constant 0 : index
    %c0_25 = arith.constant 0 : index
    %c0_26 = arith.constant 0 : index
    %c0_27 = arith.constant 0 : index
    %40 = vector.load %arg6[%c0_24, %c0_25, %c0_26, %c0_27] : memref<1x4x8x8xbf16, #tpu.memory_space<vmem>>, vector<1x4x8x8xbf16>
    %41 = vector.shape_cast %40 : vector<1x4x8x8xbf16> to vector<4x8x8xbf16>
    %42 = vector.shape_cast %39 : vector<4x8x8xbf16> to vector<1x4x8x8xbf16>
    tpu.vector_store %arg6[%c0_24, %c0_25, %c0_26, %c0_27], %42 {strides = array<i32>} : memref<1x4x8x8xbf16, #tpu.memory_space<vmem>>, vector<1x4x8x8xbf16>,
    return
  }
  func.func @transform_0(%arg0: i32) -> (i32, i32, i32, i32) {
    %c0_i32 = arith.constant 0 : i32
    %c0_i32_0 = arith.constant 0 : i32
    %c0_i32_1 = arith.constant 0 : i32
    %c0_i32_2 = arith.constant 0 : i32
    return %arg0, %c0_i32, %c0_i32_0, %c0_i32_1 : i32, i32, i32, i32
  }
  func.func @transform_1(%arg0: i32) -> (i32, i32, i32, i32) {
    %c0_i32 = arith.constant 0 : i32
    %c0_i32_0 = arith.constant 0 : i32
    %c0_i32_1 = arith.constant 0 : i32
    %c0_i32_2 = arith.constant 0 : i32
    return %arg0, %c0_i32, %c0_i32_0, %c0_i32_1 : i32, i32, i32, i32
  }
  func.func @transform_2(%arg0: i32) -> (i32, i32, i32, i32) {
    %c0_i32 = arith.constant 0 : i32
    %c0_i32_0 = arith.constant 0 : i32
    %c0_i32_1 = arith.constant 0 : i32
    %c0_i32_2 = arith.constant 0 : i32
    return %arg0, %c0_i32, %c0_i32_0, %c0_i32_1 : i32, i32, i32, i32
  }
  func.func @transform_3(%arg0: i32) -> (i32, i32, i32) {
    %c0_i32 = arith.constant 0 : i32
    %c0_i32_0 = arith.constant 0 : i32
    %c0_i32_1 = arith.constant 0 : i32
    return %arg0, %c0_i32, %c0_i32_0 : i32, i32, i32
  }
  func.func @transform_4(%arg0: i32) -> (i32, i32, i32) {
    %c0_i32 = arith.constant 0 : i32
    %c0_i32_0 = arith.constant 0 : i32
    %c0_i32_1 = arith.constant 0 : i32
    return %arg0, %c0_i32, %c0_i32_0 : i32, i32, i32
  }
  func.func @transform_5(%arg0: i32) -> (i32, i32, i32, i32) {
    %c0_i32 = arith.constant 0 : i32
    %c0_i32_0 = arith.constant 0 : i32
    %c0_i32_1 = arith.constant 0 : i32
    %c0_i32_2 = arith.constant 0 : i32
    return %arg0, %c0_i32, %c0_i32_0, %c0_i32_1 : i32, i32, i32, i32
  }
}

module attributes {stable_mosaic.version = 11 : i64} {
  func.func @_matmul_kernel(%arg0: i32, %arg1: i32, %arg2: i32, %arg3: memref<16x32xbf16, #tpu.memory_space<vmem>>, %arg4: memref<32x32xbf16, #tpu.memory_space<vmem>>, %arg5: memref<1x32xf32, #tpu.memory_space<vmem>>, %arg6: memref<16x32xf32, #tpu.memory_space<vmem>>, %arg7: memref<16x32xf32, #tpu.memory_space<vmem>>) attributes {dimension_semantics = [#tpu.dimension_semantics<parallel>, #tpu.dimension_semantics<parallel>, #tpu.dimension_semantics<arbitrary>], iteration_bounds = array<i64: 1, 1, 1>, scalar_prefetch = 0 : i64, scratch_operands = 1 : i64, tpu.core_type = #tpu.core_type<tc>, window_params = [{transform_indices = @transform_0, window_bounds = array<i64: 16, 32>}, {transform_indices = @transform_1, window_bounds = array<i64: 32, 32>}, {transform_indices = @transform_2, window_bounds = array<i64: 1, 32>}, {transform_indices = @transform_3, window_bounds = array<i64: 16, 32>}]} {
    %c0_i32 = arith.constant 0 : i32
    %0 = arith.cmpi eq, %arg2, %c0_i32 : i32
    %1 = arith.extui %0 : i1 to i32
    %c0_i32_0 = arith.constant 0 : i32
    %2 = arith.cmpi ne, %1, %c0_i32_0 : i32
    scf.if %2 {
      %cst_10 = arith.constant 0.000000e+00 : f32
      %12 = vector.broadcast %cst_10 : f32 to vector<16x32xf32>
      %c0_11 = arith.constant 0 : index
      %c0_12 = arith.constant 0 : index
      %13 = vector.load %arg7[%c0_11, %c0_12] : memref<16x32xf32, #tpu.memory_space<vmem>>, vector<16x32xf32>
      tpu.vector_store %arg7[%c0_11, %c0_12], %12 {strides = array<i32>} : memref<16x32xf32, #tpu.memory_space<vmem>>, vector<16x32xf32>,
    } else {
    }
    %c0 = arith.constant 0 : index
    %c0_1 = arith.constant 0 : index
    %3 = vector.load %arg7[%c0, %c0_1] : memref<16x32xf32, #tpu.memory_space<vmem>>, vector<16x32xf32>
    %c0_2 = arith.constant 0 : index
    %c0_3 = arith.constant 0 : index
    %4 = vector.load %arg3[%c0_2, %c0_3] : memref<16x32xbf16, #tpu.memory_space<vmem>>, vector<16x32xbf16>
    %c0_4 = arith.constant 0 : index
    %c0_5 = arith.constant 0 : index
    %5 = vector.load %arg4[%c0_4, %c0_5] : memref<32x32xbf16, #tpu.memory_space<vmem>>, vector<32x32xbf16>
    %cst = arith.constant dense<0.000000e+00> : vector<16x32xf32>
    %6 = tpu.matmul %4, %5, %cst {dimension_numbers = #tpu.dot_dimension_numbers<[1], [0], [0], [1], [0, 0, 1, 1], [], []>} : vector<16x32xbf16>, vector<32x32xbf16>, vector<16x32xf32> -> vector<16x32xf32>
    %7 = arith.addf %3, %6 : vector<16x32xf32>
    %c0_6 = arith.constant 0 : index
    %c0_7 = arith.constant 0 : index
    %8 = vector.load %arg7[%c0_6, %c0_7] : memref<16x32xf32, #tpu.memory_space<vmem>>, vector<16x32xf32>
    tpu.vector_store %arg7[%c0_6, %c0_7], %7 {strides = array<i32>} : memref<16x32xf32, #tpu.memory_space<vmem>>, vector<16x32xf32>,
    %c0_i32_8 = arith.constant 0 : i32
    %9 = arith.cmpi eq, %arg2, %c0_i32_8 : i32
    %10 = arith.extui %9 : i1 to i32
    %c0_i32_9 = arith.constant 0 : i32
    %11 = arith.cmpi ne, %10, %c0_i32_9 : i32
    scf.if %11 {
      %c0_10 = arith.constant 0 : index
      %c0_11 = arith.constant 0 : index
      %12 = vector.load %arg7[%c0_10, %c0_11] : memref<16x32xf32, #tpu.memory_space<vmem>>, vector<16x32xf32>
      %c0_12 = arith.constant 0 : index
      %c0_13 = arith.constant 0 : index
      %13 = vector.load %arg5[%c0_12, %c0_13] : memref<1x32xf32, #tpu.memory_space<vmem>>, vector<1x32xf32>
      %14 = vector.broadcast %13 : vector<1x32xf32> to vector<16x32xf32>
      %15 = arith.addf %12, %14 : vector<16x32xf32>
      %c0_14 = arith.constant 0 : index
      %c0_15 = arith.constant 0 : index
      %16 = vector.load %arg6[%c0_14, %c0_15] : memref<16x32xf32, #tpu.memory_space<vmem>>, vector<16x32xf32>
      tpu.vector_store %arg6[%c0_14, %c0_15], %15 {strides = array<i32>} : memref<16x32xf32, #tpu.memory_space<vmem>>, vector<16x32xf32>,
    } else {
    }
    return
  }
  func.func @transform_0(%arg0: i32, %arg1: i32, %arg2: i32) -> (i32, i32) {
    %c0_i32 = arith.constant 0 : i32
    return %arg0, %arg2 : i32, i32
  }
  func.func @transform_1(%arg0: i32, %arg1: i32, %arg2: i32) -> (i32, i32) {
    %c0_i32 = arith.constant 0 : i32
    return %arg2, %arg1 : i32, i32
  }
  func.func @transform_2(%arg0: i32, %arg1: i32, %arg2: i32) -> (i32, i32) {
    %c0_i32 = arith.constant 0 : i32
    %c0_i32_0 = arith.constant 0 : i32
    return %c0_i32, %arg1 : i32, i32
  }
  func.func @transform_3(%arg0: i32, %arg1: i32, %arg2: i32) -> (i32, i32) {
    %c0_i32 = arith.constant 0 : i32
    return %arg0, %arg1 : i32, i32
  }
}

module attributes {stable_mosaic.version = 11 : i64} {
  func.func @_add_ln_kernel(%arg0: i32, %arg1: memref<16x32xf32, #tpu.memory_space<vmem>>, %arg2: memref<16x32xf32, #tpu.memory_space<vmem>>, %arg3: memref<1x32xf32, #tpu.memory_space<vmem>>, %arg4: memref<1x32xf32, #tpu.memory_space<vmem>>, %arg5: memref<16x32xf32, #tpu.memory_space<vmem>>) attributes {dimension_semantics = [#tpu.dimension_semantics<parallel>], iteration_bounds = array<i64: 1>, scalar_prefetch = 0 : i64, scratch_operands = 0 : i64, tpu.core_type = #tpu.core_type<tc>, window_params = [{transform_indices = @transform_0, window_bounds = array<i64: 16, 32>}, {transform_indices = @transform_1, window_bounds = array<i64: 16, 32>}, {pipeline_mode = #tpu.pipeline_mode<synchronous>, transform_indices = @transform_2, window_bounds = array<i64: 1, 32>}, {pipeline_mode = #tpu.pipeline_mode<synchronous>, transform_indices = @transform_3, window_bounds = array<i64: 1, 32>}, {transform_indices = @transform_4, window_bounds = array<i64: 16, 32>}]} {
    %c0 = arith.constant 0 : index
    %c0_0 = arith.constant 0 : index
    %0 = vector.load %arg1[%c0, %c0_0] : memref<16x32xf32, #tpu.memory_space<vmem>>, vector<16x32xf32>
    %c0_1 = arith.constant 0 : index
    %c0_2 = arith.constant 0 : index
    %1 = vector.load %arg2[%c0_1, %c0_2] : memref<16x32xf32, #tpu.memory_space<vmem>>, vector<16x32xf32>
    %2 = arith.addf %0, %1 : vector<16x32xf32>
    %cst = arith.constant dense<0.000000e+00> : vector<16xf32>
    %3 = vector.multi_reduction <add>, %2, %cst [1] : vector<16x32xf32> to vector<16xf32>
    %4 = vector.shape_cast %3 : vector<16xf32> to vector<16x1xf32>
    %cst_3 = arith.constant 3.200000e+01 : f32
    %5 = vector.broadcast %cst_3 : f32 to vector<16x1xf32>
    %6 = arith.divf %4, %5 : vector<16x1xf32>
    %7 = vector.broadcast %6 : vector<16x1xf32> to vector<16x32xf32>
    %8 = arith.subf %2, %7 : vector<16x32xf32>
    %9 = arith.mulf %8, %8 : vector<16x32xf32>
    %cst_4 = arith.constant dense<0.000000e+00> : vector<16xf32>
    %10 = vector.multi_reduction <add>, %9, %cst_4 [1] : vector<16x32xf32> to vector<16xf32>
    %11 = vector.shape_cast %10 : vector<16xf32> to vector<16x1xf32>
    %cst_5 = arith.constant 3.200000e+01 : f32
    %12 = vector.broadcast %cst_5 : f32 to vector<16x1xf32>
    %13 = arith.divf %11, %12 : vector<16x1xf32>
    %cst_6 = arith.constant 9.99999996E-13 : f32
    %14 = vector.broadcast %cst_6 : f32 to vector<16x1xf32>
    %15 = arith.addf %13, %14 : vector<16x1xf32>
    %16 = math.rsqrt %15 : vector<16x1xf32>
    %17 = vector.broadcast %16 : vector<16x1xf32> to vector<16x32xf32>
    %18 = arith.mulf %8, %17 : vector<16x32xf32>
    %c0_7 = arith.constant 0 : index
    %c0_8 = arith.constant 0 : index
    %19 = vector.load %arg3[%c0_7, %c0_8] : memref<1x32xf32, #tpu.memory_space<vmem>>, vector<1x32xf32>
    %20 = vector.broadcast %19 : vector<1x32xf32> to vector<16x32xf32>
    %21 = arith.mulf %18, %20 : vector<16x32xf32>
    %c0_9 = arith.constant 0 : index
    %c0_10 = arith.constant 0 : index
    %22 = vector.load %arg4[%c0_9, %c0_10] : memref<1x32xf32, #tpu.memory_space<vmem>>, vector<1x32xf32>
    %23 = vector.broadcast %22 : vector<1x32xf32> to vector<16x32xf32>
    %24 = arith.addf %21, %23 : vector<16x32xf32>
    %c0_11 = arith.constant 0 : index
    %c0_12 = arith.constant 0 : index
    %25 = vector.load %arg5[%c0_11, %c0_12] : memref<16x32xf32, #tpu.memory_space<vmem>>, vector<16x32xf32>
    tpu.vector_store %arg5[%c0_11, %c0_12], %24 {strides = array<i32>} : memref<16x32xf32, #tpu.memory_space<vmem>>, vector<16x32xf32>,
    return
  }
  func.func @transform_0(%arg0: i32) -> (i32, i32) {
    %c0_i32 = arith.constant 0 : i32
    %c0_i32_0 = arith.constant 0 : i32
    return %arg0, %c0_i32 : i32, i32
  }
  func.func @transform_1(%arg0: i32) -> (i32, i32) {
    %c0_i32 = arith.constant 0 : i32
    %c0_i32_0 = arith.constant 0 : i32
    return %arg0, %c0_i32 : i32, i32
  }
  func.func @transform_2(%arg0: i32) -> (i32, i32) {
    %c0_i32 = arith.constant 0 : i32
    %c0_i32_0 = arith.constant 0 : i32
    %c0_i32_1 = arith.constant 0 : i32
    return %c0_i32, %c0_i32_0 : i32, i32
  }
  func.func @transform_3(%arg0: i32) -> (i32, i32) {
    %c0_i32 = arith.constant 0 : i32
    %c0_i32_0 = arith.constant 0 : i32
    %c0_i32_1 = arith.constant 0 : i32
    return %c0_i32, %c0_i32_0 : i32, i32
  }
  func.func @transform_4(%arg0: i32) -> (i32, i32) {
    %c0_i32 = arith.constant 0 : i32
    %c0_i32_0 = arith.constant 0 : i32
    return %arg0, %c0_i32 : i32, i32
  }
}

module attributes {stable_mosaic.version = 11 : i64} {
  func.func @_matmul_kernel(%arg0: i32, %arg1: i32, %arg2: i32, %arg3: memref<16x64xbf16, #tpu.memory_space<vmem>>, %arg4: memref<64x32xbf16, #tpu.memory_space<vmem>>, %arg5: memref<1x32xf32, #tpu.memory_space<vmem>>, %arg6: memref<16x32xf32, #tpu.memory_space<vmem>>, %arg7: memref<16x32xf32, #tpu.memory_space<vmem>>) attributes {dimension_semantics = [#tpu.dimension_semantics<parallel>, #tpu.dimension_semantics<parallel>, #tpu.dimension_semantics<arbitrary>], iteration_bounds = array<i64: 1, 1, 1>, scalar_prefetch = 0 : i64, scratch_operands = 1 : i64, tpu.core_type = #tpu.core_type<tc>, window_params = [{transform_indices = @transform_0, window_bounds = array<i64: 16, 64>}, {transform_indices = @transform_1, window_bounds = array<i64: 64, 32>}, {transform_indices = @transform_2, window_bounds = array<i64: 1, 32>}, {transform_indices = @transform_3, window_bounds = array<i64: 16, 32>}]} {
    %c0_i32 = arith.constant 0 : i32
    %0 = arith.cmpi eq, %arg2, %c0_i32 : i32
    %1 = arith.extui %0 : i1 to i32
    %c0_i32_0 = arith.constant 0 : i32
    %2 = arith.cmpi ne, %1, %c0_i32_0 : i32
    scf.if %2 {
      %cst_10 = arith.constant 0.000000e+00 : f32
      %12 = vector.broadcast %cst_10 : f32 to vector<16x32xf32>
      %c0_11 = arith.constant 0 : index
      %c0_12 = arith.constant 0 : index
      %13 = vector.load %arg7[%c0_11, %c0_12] : memref<16x32xf32, #tpu.memory_space<vmem>>, vector<16x32xf32>
      tpu.vector_store %arg7[%c0_11, %c0_12], %12 {strides = array<i32>} : memref<16x32xf32, #tpu.memory_space<vmem>>, vector<16x32xf32>,
    } else {
    }
    %c0 = arith.constant 0 : index
    %c0_1 = arith.constant 0 : index
    %3 = vector.load %arg7[%c0, %c0_1] : memref<16x32xf32, #tpu.memory_space<vmem>>, vector<16x32xf32>
    %c0_2 = arith.constant 0 : index
    %c0_3 = arith.constant 0 : index
    %4 = vector.load %arg3[%c0_2, %c0_3] : memref<16x64xbf16, #tpu.memory_space<vmem>>, vector<16x64xbf16>
    %c0_4 = arith.constant 0 : index
    %c0_5 = arith.constant 0 : index
    %5 = vector.load %arg4[%c0_4, %c0_5] : memref<64x32xbf16, #tpu.memory_space<vmem>>, vector<64x32xbf16>
    %cst = arith.constant dense<0.000000e+00> : vector<16x32xf32>
    %6 = tpu.matmul %4, %5, %cst {dimension_numbers = #tpu.dot_dimension_numbers<[1], [0], [0], [1], [0, 0, 1, 1], [], []>} : vector<16x64xbf16>, vector<64x32xbf16>, vector<16x32xf32> -> vector<16x32xf32>
    %7 = arith.addf %3, %6 : vector<16x32xf32>
    %c0_6 = arith.constant 0 : index
    %c0_7 = arith.constant 0 : index
    %8 = vector.load %arg7[%c0_6, %c0_7] : memref<16x32xf32, #tpu.memory_space<vmem>>, vector<16x32xf32>
    tpu.vector_store %arg7[%c0_6, %c0_7], %7 {strides = array<i32>} : memref<16x32xf32, #tpu.memory_space<vmem>>, vector<16x32xf32>,
    %c0_i32_8 = arith.constant 0 : i32
    %9 = arith.cmpi eq, %arg2, %c0_i32_8 : i32
    %10 = arith.extui %9 : i1 to i32
    %c0_i32_9 = arith.constant 0 : i32
    %11 = arith.cmpi ne, %10, %c0_i32_9 : i32
    scf.if %11 {
      %c0_10 = arith.constant 0 : index
      %c0_11 = arith.constant 0 : index
      %12 = vector.load %arg7[%c0_10, %c0_11] : memref<16x32xf32, #tpu.memory_space<vmem>>, vector<16x32xf32>
      %c0_12 = arith.constant 0 : index
      %c0_13 = arith.constant 0 : index
      %13 = vector.load %arg5[%c0_12, %c0_13] : memref<1x32xf32, #tpu.memory_space<vmem>>, vector<1x32xf32>
      %14 = vector.broadcast %13 : vector<1x32xf32> to vector<16x32xf32>
      %15 = arith.addf %12, %14 : vector<16x32xf32>
      %c0_14 = arith.constant 0 : index
      %c0_15 = arith.constant 0 : index
      %16 = vector.load %arg6[%c0_14, %c0_15] : memref<16x32xf32, #tpu.memory_space<vmem>>, vector<16x32xf32>
      tpu.vector_store %arg6[%c0_14, %c0_15], %15 {strides = array<i32>} : memref<16x32xf32, #tpu.memory_space<vmem>>, vector<16x32xf32>,
    } else {
    }
    return
  }
  func.func @transform_0(%arg0: i32, %arg1: i32, %arg2: i32) -> (i32, i32) {
    %c0_i32 = arith.constant 0 : i32
    return %arg0, %arg2 : i32, i32
  }
  func.func @transform_1(%arg0: i32, %arg1: i32, %arg2: i32) -> (i32, i32) {
    %c0_i32 = arith.constant 0 : i32
    return %arg2, %arg1 : i32, i32
  }
  func.func @transform_2(%arg0: i32, %arg1: i32, %arg2: i32) -> (i32, i32) {
    %c0_i32 = arith.constant 0 : i32
    %c0_i32_0 = arith.constant 0 : i32
    return %c0_i32, %arg1 : i32, i32
  }
  func.func @transform_3(%arg0: i32, %arg1: i32, %arg2: i32) -> (i32, i32) {
    %c0_i32 = arith.constant 0 : i32
    return %arg0, %arg1 : i32, i32
  }
}

module attributes {stable_mosaic.version = 11 : i64} {
  func.func @_matmul_kernel(%arg0: i32, %arg1: i32, %arg2: i32, %arg3: memref<16x32xbf16, #tpu.memory_space<vmem>>, %arg4: memref<32x64xbf16, #tpu.memory_space<vmem>>, %arg5: memref<1x64xf32, #tpu.memory_space<vmem>>, %arg6: memref<16x64xbf16, #tpu.memory_space<vmem>>, %arg7: memref<16x64xf32, #tpu.memory_space<vmem>>) attributes {dimension_semantics = [#tpu.dimension_semantics<parallel>, #tpu.dimension_semantics<parallel>, #tpu.dimension_semantics<arbitrary>], iteration_bounds = array<i64: 1, 1, 1>, scalar_prefetch = 0 : i64, scratch_operands = 1 : i64, tpu.core_type = #tpu.core_type<tc>, window_params = [{transform_indices = @transform_0, window_bounds = array<i64: 16, 32>}, {transform_indices = @transform_1, window_bounds = array<i64: 32, 64>}, {transform_indices = @transform_2, window_bounds = array<i64: 1, 64>}, {transform_indices = @transform_3, window_bounds = array<i64: 16, 64>}]} {
    %c0_i32 = arith.constant 0 : i32
    %0 = arith.cmpi eq, %arg2, %c0_i32 : i32
    %1 = arith.extui %0 : i1 to i32
    %c0_i32_0 = arith.constant 0 : i32
    %2 = arith.cmpi ne, %1, %c0_i32_0 : i32
    scf.if %2 {
      %cst_10 = arith.constant 0.000000e+00 : f32
      %12 = vector.broadcast %cst_10 : f32 to vector<16x64xf32>
      %c0_11 = arith.constant 0 : index
      %c0_12 = arith.constant 0 : index
      %13 = vector.load %arg7[%c0_11, %c0_12] : memref<16x64xf32, #tpu.memory_space<vmem>>, vector<16x64xf32>
      tpu.vector_store %arg7[%c0_11, %c0_12], %12 {strides = array<i32>} : memref<16x64xf32, #tpu.memory_space<vmem>>, vector<16x64xf32>,
    } else {
    }
    %c0 = arith.constant 0 : index
    %c0_1 = arith.constant 0 : index
    %3 = vector.load %arg7[%c0, %c0_1] : memref<16x64xf32, #tpu.memory_space<vmem>>, vector<16x64xf32>
    %c0_2 = arith.constant 0 : index
    %c0_3 = arith.constant 0 : index
    %4 = vector.load %arg3[%c0_2, %c0_3] : memref<16x32xbf16, #tpu.memory_space<vmem>>, vector<16x32xbf16>
    %c0_4 = arith.constant 0 : index
    %c0_5 = arith.constant 0 : index
    %5 = vector.load %arg4[%c0_4, %c0_5] : memref<32x64xbf16, #tpu.memory_space<vmem>>, vector<32x64xbf16>
    %cst = arith.constant dense<0.000000e+00> : vector<16x64xf32>
    %6 = tpu.matmul %4, %5, %cst {dimension_numbers = #tpu.dot_dimension_numbers<[1], [0], [0], [1], [0, 0, 1, 1], [], []>} : vector<16x32xbf16>, vector<32x64xbf16>, vector<16x64xf32> -> vector<16x64xf32>
    %7 = arith.addf %3, %6 : vector<16x64xf32>
    %c0_6 = arith.constant 0 : index
    %c0_7 = arith.constant 0 : index
    %8 = vector.load %arg7[%c0_6, %c0_7] : memref<16x64xf32, #tpu.memory_space<vmem>>, vector<16x64xf32>
    tpu.vector_store %arg7[%c0_6, %c0_7], %7 {strides = array<i32>} : memref<16x64xf32, #tpu.memory_space<vmem>>, vector<16x64xf32>,
    %c0_i32_8 = arith.constant 0 : i32
    %9 = arith.cmpi eq, %arg2, %c0_i32_8 : i32
    %10 = arith.extui %9 : i1 to i32
    %c0_i32_9 = arith.constant 0 : i32
    %11 = arith.cmpi ne, %10, %c0_i32_9 : i32
    scf.if %11 {
      %c0_10 = arith.constant 0 : index
      %c0_11 = arith.constant 0 : index
      %12 = vector.load %arg7[%c0_10, %c0_11] : memref<16x64xf32, #tpu.memory_space<vmem>>, vector<16x64xf32>
      %c0_12 = arith.constant 0 : index
      %c0_13 = arith.constant 0 : index
      %13 = vector.load %arg5[%c0_12, %c0_13] : memref<1x64xf32, #tpu.memory_space<vmem>>, vector<1x64xf32>
      %14 = vector.broadcast %13 : vector<1x64xf32> to vector<16x64xf32>
      %15 = arith.addf %12, %14 : vector<16x64xf32>
      %16 = arith.truncf %15 : vector<16x64xf32> to vector<16x64xbf16>
      %c0_14 = arith.constant 0 : index
      %c0_15 = arith.constant 0 : index
      %17 = vector.load %arg6[%c0_14, %c0_15] : memref<16x64xbf16, #tpu.memory_space<vmem>>, vector<16x64xbf16>
      tpu.vector_store %arg6[%c0_14, %c0_15], %16 {strides = array<i32>} : memref<16x64xbf16, #tpu.memory_space<vmem>>, vector<16x64xbf16>,
    } else {
    }
    return
  }
  func.func @transform_0(%arg0: i32, %arg1: i32, %arg2: i32) -> (i32, i32) {
    %c0_i32 = arith.constant 0 : i32
    return %arg0, %arg2 : i32, i32
  }
  func.func @transform_1(%arg0: i32, %arg1: i32, %arg2: i32) -> (i32, i32) {
    %c0_i32 = arith.constant 0 : i32
    return %arg2, %arg1 : i32, i32
  }
  func.func @transform_2(%arg0: i32, %arg1: i32, %arg2: i32) -> (i32, i32) {
    %c0_i32 = arith.constant 0 : i32
    %c0_i32_0 = arith.constant 0 : i32
    return %c0_i32, %arg1 : i32, i32
  }
  func.func @transform_3(%arg0: i32, %arg1: i32, %arg2: i32) -> (i32, i32) {
    %c0_i32 = arith.constant 0 : i32
    return %arg0, %arg1 : i32, i32
  }
}

module attributes {stable_mosaic.version = 11 : i64} {
  func.func @_matmul_kernel(%arg0: i32, %arg1: i32, %arg2: i32, %arg3: memref<16x32xbf16, #tpu.memory_space<vmem>>, %arg4: memref<32x64xbf16, #tpu.memory_space<vmem>>, %arg5: memref<1x64xf32, #tpu.memory_space<vmem>>, %arg6: memref<16x64xbf16, #tpu.memory_space<vmem>>, %arg7: memref<16x64xf32, #tpu.memory_space<vmem>>) attributes {dimension_semantics = [#tpu.dimension_semantics<parallel>, #tpu.dimension_semantics<parallel>, #tpu.dimension_semantics<arbitrary>], iteration_bounds = array<i64: 1, 1, 1>, scalar_prefetch = 0 : i64, scratch_operands = 1 : i64, tpu.core_type = #tpu.core_type<tc>, window_params = [{transform_indices = @transform_0, window_bounds = array<i64: 16, 32>}, {transform_indices = @transform_1, window_bounds = array<i64: 32, 64>}, {transform_indices = @transform_2, window_bounds = array<i64: 1, 64>}, {transform_indices = @transform_3, window_bounds = array<i64: 16, 64>}]} {
    %c0_i32 = arith.constant 0 : i32
    %0 = arith.cmpi eq, %arg2, %c0_i32 : i32
    %1 = arith.extui %0 : i1 to i32
    %c0_i32_0 = arith.constant 0 : i32
    %2 = arith.cmpi ne, %1, %c0_i32_0 : i32
    scf.if %2 {
      %cst_10 = arith.constant 0.000000e+00 : f32
      %12 = vector.broadcast %cst_10 : f32 to vector<16x64xf32>
      %c0_11 = arith.constant 0 : index
      %c0_12 = arith.constant 0 : index
      %13 = vector.load %arg7[%c0_11, %c0_12] : memref<16x64xf32, #tpu.memory_space<vmem>>, vector<16x64xf32>
      tpu.vector_store %arg7[%c0_11, %c0_12], %12 {strides = array<i32>} : memref<16x64xf32, #tpu.memory_space<vmem>>, vector<16x64xf32>,
    } else {
    }
    %c0 = arith.constant 0 : index
    %c0_1 = arith.constant 0 : index
    %3 = vector.load %arg7[%c0, %c0_1] : memref<16x64xf32, #tpu.memory_space<vmem>>, vector<16x64xf32>
    %c0_2 = arith.constant 0 : index
    %c0_3 = arith.constant 0 : index
    %4 = vector.load %arg3[%c0_2, %c0_3] : memref<16x32xbf16, #tpu.memory_space<vmem>>, vector<16x32xbf16>
    %c0_4 = arith.constant 0 : index
    %c0_5 = arith.constant 0 : index
    %5 = vector.load %arg4[%c0_4, %c0_5] : memref<32x64xbf16, #tpu.memory_space<vmem>>, vector<32x64xbf16>
    %cst = arith.constant dense<0.000000e+00> : vector<16x64xf32>
    %6 = tpu.matmul %4, %5, %cst {dimension_numbers = #tpu.dot_dimension_numbers<[1], [0], [0], [1], [0, 0, 1, 1], [], []>} : vector<16x32xbf16>, vector<32x64xbf16>, vector<16x64xf32> -> vector<16x64xf32>
    %7 = arith.addf %3, %6 : vector<16x64xf32>
    %c0_6 = arith.constant 0 : index
    %c0_7 = arith.constant 0 : index
    %8 = vector.load %arg7[%c0_6, %c0_7] : memref<16x64xf32, #tpu.memory_space<vmem>>, vector<16x64xf32>
    tpu.vector_store %arg7[%c0_6, %c0_7], %7 {strides = array<i32>} : memref<16x64xf32, #tpu.memory_space<vmem>>, vector<16x64xf32>,
    %c0_i32_8 = arith.constant 0 : i32
    %9 = arith.cmpi eq, %arg2, %c0_i32_8 : i32
    %10 = arith.extui %9 : i1 to i32
    %c0_i32_9 = arith.constant 0 : i32
    %11 = arith.cmpi ne, %10, %c0_i32_9 : i32
    scf.if %11 {
      %c0_10 = arith.constant 0 : index
      %c0_11 = arith.constant 0 : index
      %12 = vector.load %arg7[%c0_10, %c0_11] : memref<16x64xf32, #tpu.memory_space<vmem>>, vector<16x64xf32>
      %c0_12 = arith.constant 0 : index
      %c0_13 = arith.constant 0 : index
      %13 = vector.load %arg5[%c0_12, %c0_13] : memref<1x64xf32, #tpu.memory_space<vmem>>, vector<1x64xf32>
      %14 = vector.broadcast %13 : vector<1x64xf32> to vector<16x64xf32>
      %15 = arith.addf %12, %14 : vector<16x64xf32>
      %cst_14 = arith.constant 0.000000e+00 : f32
      %16 = vector.broadcast %cst_14 : f32 to vector<16x64xf32>
      %17 = arith.maximumf %15, %16 : vector<16x64xf32>
      %18 = arith.truncf %17 : vector<16x64xf32> to vector<16x64xbf16>
      %c0_15 = arith.constant 0 : index
      %c0_16 = arith.constant 0 : index
      %19 = vector.load %arg6[%c0_15, %c0_16] : memref<16x64xbf16, #tpu.memory_space<vmem>>, vector<16x64xbf16>
      tpu.vector_store %arg6[%c0_15, %c0_16], %18 {strides = array<i32>} : memref<16x64xbf16, #tpu.memory_space<vmem>>, vector<16x64xbf16>,
    } else {
    }
    return
  }
  func.func @transform_0(%arg0: i32, %arg1: i32, %arg2: i32) -> (i32, i32) {
    %c0_i32 = arith.constant 0 : i32
    return %arg0, %arg2 : i32, i32
  }
  func.func @transform_1(%arg0: i32, %arg1: i32, %arg2: i32) -> (i32, i32) {
    %c0_i32 = arith.constant 0 : i32
    return %arg2, %arg1 : i32, i32
  }
  func.func @transform_2(%arg0: i32, %arg1: i32, %arg2: i32) -> (i32, i32) {
    %c0_i32 = arith.constant 0 : i32
    %c0_i32_0 = arith.constant 0 : i32
    return %c0_i32, %arg1 : i32, i32
  }
  func.func @transform_3(%arg0: i32, %arg1: i32, %arg2: i32) -> (i32, i32) {
    %c0_i32 = arith.constant 0 : i32
    return %arg0, %arg1 : i32, i32
  }
}

module attributes {stable_mosaic.version = 11 : i64} {
  func.func @_attn_kernel(%arg0: i32, %arg1: memref<1x4x8x8xbf16, #tpu.memory_space<vmem>>, %arg2: memref<1x4x8x8xbf16, #tpu.memory_space<vmem>>, %arg3: memref<1x4x8x8xbf16, #tpu.memory_space<vmem>>, %arg4: memref<1x8x1xf32, #tpu.memory_space<vmem>>, %arg5: memref<1x1x8xf32, #tpu.memory_space<vmem>>, %arg6: memref<1x4x8x8xbf16, #tpu.memory_space<vmem>>) attributes {dimension_semantics = [#tpu.dimension_semantics<parallel>], iteration_bounds = array<i64: 2>, scalar_prefetch = 0 : i64, scratch_operands = 0 : i64, tpu.core_type = #tpu.core_type<tc>, window_params = [{transform_indices = @transform_0, window_bounds = array<i64: 1, 4, 8, 8>}, {transform_indices = @transform_1, window_bounds = array<i64: 1, 4, 8, 8>}, {transform_indices = @transform_2, window_bounds = array<i64: 1, 4, 8, 8>}, {transform_indices = @transform_3, window_bounds = array<i64: 1, 8, 1>}, {transform_indices = @transform_4, window_bounds = array<i64: 1, 1, 8>}, {transform_indices = @transform_5, window_bounds = array<i64: 1, 4, 8, 8>}]} {
    %c0 = arith.constant 0 : index
    %c0_0 = arith.constant 0 : index
    %c0_1 = arith.constant 0 : index
    %c0_2 = arith.constant 0 : index
    %0 = vector.load %arg1[%c0, %c0_0, %c0_1, %c0_2] : memref<1x4x8x8xbf16, #tpu.memory_space<vmem>>, vector<1x4x8x8xbf16>
    %1 = vector.shape_cast %0 : vector<1x4x8x8xbf16> to vector<4x8x8xbf16>
    %2 = arith.extf %1 : vector<4x8x8xbf16> to vector<4x8x8xf32>
    %cst = arith.constant 0.353553385 : f32
    %3 = vector.broadcast %cst : f32 to vector<4x8x8xf32>
    %4 = arith.mulf %2, %3 : vector<4x8x8xf32>
    %5 = arith.truncf %4 : vector<4x8x8xf32> to vector<4x8x8xbf16>
    %c0_3 = arith.constant 0 : index
    %c0_4 = arith.constant 0 : index
    %c0_5 = arith.constant 0 : index
    %c0_6 = arith.constant 0 : index
    %6 = vector.load %arg2[%c0_3, %c0_4, %c0_5, %c0_6] : memref<1x4x8x8xbf16, #tpu.memory_space<vmem>>, vector<1x4x8x8xbf16>
    %7 = vector.shape_cast %6 : vector<1x4x8x8xbf16> to vector<4x8x8xbf16>
    %c0_7 = arith.constant 0 : index
    %c0_8 = arith.constant 0 : index
    %c0_9 = arith.constant 0 : index
    %c0_10 = arith.constant 0 : index
    %8 = vector.load %arg3[%c0_7, %c0_8, %c0_9, %c0_10] : memref<1x4x8x8xbf16, #tpu.memory_space<vmem>>, vector<1x4x8x8xbf16>
    %9 = vector.shape_cast %8 : vector<1x4x8x8xbf16> to vector<4x8x8xbf16>
    "tpu.trace_start"() <{level = 10 : i32, message = "hqd,hkd->hqk"}> : () -> ()
    %cst_11 = arith.constant dense<0.000000e+00> : vector<4x8x8xf32>
    %10 = tpu.matmul %5, %7, %cst_11 {dimension_numbers = #tpu.dot_dimension_numbers<[2], [2], [1], [1], [0, 0, 0, 1, 1, 1], [0], [0]>} : vector<4x8x8xbf16>, vector<4x8x8xbf16>, vector<4x8x8xf32> -> vector<4x8x8xf32>
    "tpu.trace_stop"() : () -> ()
    %c0_12 = arith.constant 0 : index
    %c0_13 = arith.constant 0 : index
    %c0_14 = arith.constant 0 : index
    %11 = vector.load %arg4[%c0_12, %c0_13, %c0_14] : memref<1x8x1xf32, #tpu.memory_space<vmem>>, vector<1x8x1xf32>
    %12 = vector.shape_cast %11 : vector<1x8x1xf32> to vector<8x1xf32>
    %cst_15 = arith.constant 5.000000e-01 : f32
    %13 = vector.broadcast %cst_15 : f32 to vector<8x1xf32>
    %14 = arith.cmpf ogt, %12, %13 : vector<8x1xf32>
    %c0_16 = arith.constant 0 : index
    %c0_17 = arith.constant 0 : index
    %c0_18 = arith.constant 0 : index
    %15 = vector.load %arg5[%c0_16, %c0_17, %c0_18] : memref<1x1x8xf32, #tpu.memory_space<vmem>>, vector<1x1x8xf32>
    %16 = vector.shape_cast %15 : vector<1x1x8xf32> to vector<1x8xf32>
    %cst_19 = arith.constant 5.000000e-01 : f32
    %17 = vector.broadcast %cst_19 : f32 to vector<1x8xf32>
    %18 = arith.cmpf ogt, %16, %17 : vector<1x8xf32>
    %19 = vector.broadcast %14 : vector<8x1xi1> to vector<8x8xi1>
    %20 = vector.broadcast %18 : vector<1x8xi1> to vector<8x8xi1>
    %21 = arith.andi %19, %20 : vector<8x8xi1>
    %22 = tpu.iota {dimensions = array<i32: 0>} : vector<8x8xi32>
    %23 = tpu.iota {dimensions = array<i32: 1>} : vector<8x8xi32>
    %24 = arith.cmpi sge, %22, %23 : vector<8x8xi32>
    %25 = arith.andi %21, %24 : vector<8x8xi1>
    %26 = vector.shape_cast %25 : vector<8x8xi1> to vector<1x8x8xi1>
    %cst_20 = arith.constant -1.000000e+04 : f32
    %27 = vector.shape_cast %26 : vector<1x8x8xi1> to vector<1x8x8xi1>
    %28 = vector.broadcast %27 : vector<1x8x8xi1> to vector<4x8x8xi1>
    %29 = vector.broadcast %cst_20 : f32 to vector<4x8x8xf32>
    %30 = arith.select %28, %10, %29 : vector<4x8x8xi1>, vector<4x8x8xf32>
    %cst_21 = arith.constant dense<0xFF800000> : vector<4x8xf32>
    %31 = vector.multi_reduction <maximumf>, %30, %cst_21 [2] : vector<4x8x8xf32> to vector<4x8xf32>
    %32 = vector.shape_cast %31 : vector<4x8xf32> to vector<4x8x1xf32>
    %33 = vector.broadcast %32 : vector<4x8x1xf32> to vector<4x8x8xf32>
    %34 = arith.subf %30, %33 : vector<4x8x8xf32>
    %35 = math.exp %34 : vector<4x8x8xf32>
    %cst_22 = arith.constant dense<0.000000e+00> : vector<4x8xf32>
    %36 = vector.multi_reduction <add>, %35, %cst_22 [2] : vector<4x8x8xf32> to vector<4x8xf32>
    %37 = vector.shape_cast %36 : vector<4x8xf32> to vector<4x8x1xf32>
    %38 = tpu.reciprocal %37 {approx = true} : vector<4x8x1xf32> -> vector<4x8x1xf32>
    %39 = vector.broadcast %38 : vector<4x8x1xf32> to vector<4x8x8xf32>
    %40 = arith.mulf %35, %39 : vector<4x8x8xf32>
    %41 = arith.truncf %40 : vector<4x8x8xf32> to vector<4x8x8xbf16>
    "tpu.trace_start"() <{level = 10 : i32, message = "hqk,hkd->hqd"}> : () -> ()
    %cst_23 = arith.constant dense<0.000000e+00> : vector<4x8x8xf32>
    %42 = tpu.matmul %41, %9, %cst_23 {dimension_numbers = #tpu.dot_dimension_numbers<[2], [1], [1], [2], [0, 0, 0, 1, 1, 2], [0], [0]>} : vector<4x8x8xbf16>, vector<4x8x8xbf16>, vector<4x8x8xf32> -> vector<4x8x8xf32>
    "tpu.trace_stop"() : () -> ()
    %43 = arith.truncf %42 : vector<4x8x8xf32> to vector<4x8x8xbf16>
    %c0_24 = arith.constant 0 : index
    %c0_25 = arith.constant 0 : index
    %c0_26 = arith.constant 0 : index
    %c0_27 = arith.constant 0 : index
    %44 = vector.load %arg6[%c0_24, %c0_25, %c0_26, %c0_27] : memref<1x4x8x8xbf16, #tpu.memory_space<vmem>>, vector<1x4x8x8xbf16>
    %45 = vector.shape_cast %44 : vector<1x4x8x8xbf16> to vector<4x8x8xbf16>
    %46 = vector.shape_cast %43 : vector<4x8x8xbf16> to vector<1x4x8x8xbf16>
    tpu.vector_store %arg6[%c0_24, %c0_25, %c0_26, %c0_27], %46 {strides = array<i32>} : memref<1x4x8x8xbf16, #tpu.memory_space<vmem>>, vector<1x4x8x8xbf16>,
    return
  }
  func.func @transform_0(%arg0: i32) -> (i32, i32, i32, i32) {
    %c0_i32 = arith.constant 0 : i32
    %c0_i32_0 = arith.constant 0 : i32
    %c0_i32_1 = arith.constant 0 : i32
    %c0_i32_2 = arith.constant 0 : i32
    return %arg0, %c0_i32, %c0_i32_0, %c0_i32_1 : i32, i32, i32, i32
  }
  func.func @transform_1(%arg0: i32) -> (i32, i32, i32, i32) {
    %c0_i32 = arith.constant 0 : i32
    %c0_i32_0 = arith.constant 0 : i32
    %c0_i32_1 = arith.constant 0 : i32
    %c0_i32_2 = arith.constant 0 : i32
    return %arg0, %c0_i32, %c0_i32_0, %c0_i32_1 : i32, i32, i32, i32
  }
  func.func @transform_2(%arg0: i32) -> (i32, i32, i32, i32) {
    %c0_i32 = arith.constant 0 : i32
    %c0_i32_0 = arith.constant 0 : i32
    %c0_i32_1 = arith.constant 0 : i32
    %c0_i32_2 = arith.constant 0 : i32
    return %arg0, %c0_i32, %c0_i32_0, %c0_i32_1 : i32, i32, i32, i32
  }
  func.func @transform_3(%arg0: i32) -> (i32, i32, i32) {
    %c0_i32 = arith.constant 0 : i32
    %c0_i32_0 = arith.constant 0 : i32
    %c0_i32_1 = arith.constant 0 : i32
    return %arg0, %c0_i32, %c0_i32_0 : i32, i32, i32
  }
  func.func @transform_4(%arg0: i32) -> (i32, i32, i32) {
    %c0_i32 = arith.constant 0 : i32
    %c0_i32_0 = arith.constant 0 : i32
    %c0_i32_1 = arith.constant 0 : i32
    return %arg0, %c0_i32, %c0_i32_0 : i32, i32, i32
  }
  func.func @transform_5(%arg0: i32) -> (i32, i32, i32, i32) {
    %c0_i32 = arith.constant 0 : i32
    %c0_i32_0 = arith.constant 0 : i32
    %c0_i32_1 = arith.constant 0 : i32
    %c0_i32_2 = arith.constant 0 : i32
    return %arg0, %c0_i32, %c0_i32_0, %c0_i32_1 : i32, i32, i32, i32
  }
}

module attributes {stable_mosaic.version = 11 : i64} {
  func.func @_matmul_kernel(%arg0: i32, %arg1: i32, %arg2: i32, %arg3: memref<16x32xbf16, #tpu.memory_space<vmem>>, %arg4: memref<32x32xbf16, #tpu.memory_space<vmem>>, %arg5: memref<1x32xf32, #tpu.memory_space<vmem>>, %arg6: memref<16x32xbf16, #tpu.memory_space<vmem>>, %arg7: memref<16x32xf32, #tpu.memory_space<vmem>>) attributes {dimension_semantics = [#tpu.dimension_semantics<parallel>, #tpu.dimension_semantics<parallel>, #tpu.dimension_semantics<arbitrary>], iteration_bounds = array<i64: 1, 1, 1>, scalar_prefetch = 0 : i64, scratch_operands = 1 : i64, tpu.core_type = #tpu.core_type<tc>, window_params = [{transform_indices = @transform_0, window_bounds = array<i64: 16, 32>}, {transform_indices = @transform_1, window_bounds = array<i64: 32, 32>}, {transform_indices = @transform_2, window_bounds = array<i64: 1, 32>}, {transform_indices = @transform_3, window_bounds = array<i64: 16, 32>}]} {
    %c0_i32 = arith.constant 0 : i32
    %0 = arith.cmpi eq, %arg2, %c0_i32 : i32
    %1 = arith.extui %0 : i1 to i32
    %c0_i32_0 = arith.constant 0 : i32
    %2 = arith.cmpi ne, %1, %c0_i32_0 : i32
    scf.if %2 {
      %cst_10 = arith.constant 0.000000e+00 : f32
      %12 = vector.broadcast %cst_10 : f32 to vector<16x32xf32>
      %c0_11 = arith.constant 0 : index
      %c0_12 = arith.constant 0 : index
      %13 = vector.load %arg7[%c0_11, %c0_12] : memref<16x32xf32, #tpu.memory_space<vmem>>, vector<16x32xf32>
      tpu.vector_store %arg7[%c0_11, %c0_12], %12 {strides = array<i32>} : memref<16x32xf32, #tpu.memory_space<vmem>>, vector<16x32xf32>,
    } else {
    }
    %c0 = arith.constant 0 : index
    %c0_1 = arith.constant 0 : index
    %3 = vector.load %arg7[%c0, %c0_1] : memref<16x32xf32, #tpu.memory_space<vmem>>, vector<16x32xf32>
    %c0_2 = arith.constant 0 : index
    %c0_3 = arith.constant 0 : index
    %4 = vector.load %arg3[%c0_2, %c0_3] : memref<16x32xbf16, #tpu.memory_space<vmem>>, vector<16x32xbf16>
    %c0_4 = arith.constant 0 : index
    %c0_5 = arith.constant 0 : index
    %5 = vector.load %arg4[%c0_4, %c0_5] : memref<32x32xbf16, #tpu.memory_space<vmem>>, vector<32x32xbf16>
    %cst = arith.constant dense<0.000000e+00> : vector<16x32xf32>
    %6 = tpu.matmul %4, %5, %cst {dimension_numbers = #tpu.dot_dimension_numbers<[1], [0], [0], [1], [0, 0, 1, 1], [], []>} : vector<16x32xbf16>, vector<32x32xbf16>, vector<16x32xf32> -> vector<16x32xf32>
    %7 = arith.addf %3, %6 : vector<16x32xf32>
    %c0_6 = arith.constant 0 : index
    %c0_7 = arith.constant 0 : index
    %8 = vector.load %arg7[%c0_6, %c0_7] : memref<16x32xf32, #tpu.memory_space<vmem>>, vector<16x32xf32>
    tpu.vector_store %arg7[%c0_6, %c0_7], %7 {strides = array<i32>} : memref<16x32xf32, #tpu.memory_space<vmem>>, vector<16x32xf32>,
    %c0_i32_8 = arith.constant 0 : i32
    %9 = arith.cmpi eq, %arg2, %c0_i32_8 : i32
    %10 = arith.extui %9 : i1 to i32
    %c0_i32_9 = arith.constant 0 : i32
    %11 = arith.cmpi ne, %10, %c0_i32_9 : i32
    scf.if %11 {
      %c0_10 = arith.constant 0 : index
      %c0_11 = arith.constant 0 : index
      %12 = vector.load %arg7[%c0_10, %c0_11] : memref<16x32xf32, #tpu.memory_space<vmem>>, vector<16x32xf32>
      %c0_12 = arith.constant 0 : index
      %c0_13 = arith.constant 0 : index
      %13 = vector.load %arg5[%c0_12, %c0_13] : memref<1x32xf32, #tpu.memory_space<vmem>>, vector<1x32xf32>
      %14 = vector.broadcast %13 : vector<1x32xf32> to vector<16x32xf32>
      %15 = arith.addf %12, %14 : vector<16x32xf32>
      %16 = arith.truncf %15 : vector<16x32xf32> to vector<16x32xbf16>
      %c0_14 = arith.constant 0 : index
      %c0_15 = arith.constant 0 : index
      %17 = vector.load %arg6[%c0_14, %c0_15] : memref<16x32xbf16, #tpu.memory_space<vmem>>, vector<16x32xbf16>
      tpu.vector_store %arg6[%c0_14, %c0_15], %16 {strides = array<i32>} : memref<16x32xbf16, #tpu.memory_space<vmem>>, vector<16x32xbf16>,
    } else {
    }
    return
  }
  func.func @transform_0(%arg0: i32, %arg1: i32, %arg2: i32) -> (i32, i32) {
    %c0_i32 = arith.constant 0 : i32
    return %arg0, %arg2 : i32, i32
  }
  func.func @transform_1(%arg0: i32, %arg1: i32, %arg2: i32) -> (i32, i32) {
    %c0_i32 = arith.constant 0 : i32
    return %arg2, %arg1 : i32, i32
  }
  func.func @transform_2(%arg0: i32, %arg1: i32, %arg2: i32) -> (i32, i32) {
    %c0_i32 = arith.constant 0 : i32
    %c0_i32_0 = arith.constant 0 : i32
    return %c0_i32, %arg1 : i32, i32
  }
  func.func @transform_3(%arg0: i32, %arg1: i32, %arg2: i32) -> (i32, i32) {
    %c0_i32 = arith.constant 0 : i32
    return %arg0, %arg1 : i32, i32
  }
}

module attributes {stable_mosaic.version = 11 : i64} {
  func.func @_matmul_kernel(%arg0: i32, %arg1: i32, %arg2: i32, %arg3: memref<16x32xbf16, #tpu.memory_space<vmem>>, %arg4: memref<32x60xbf16, #tpu.memory_space<vmem>>, %arg5: memref<1x60xf32, #tpu.memory_space<vmem>>, %arg6: memref<16x60xf32, #tpu.memory_space<vmem>>, %arg7: memref<16x60xf32, #tpu.memory_space<vmem>>) attributes {dimension_semantics = [#tpu.dimension_semantics<parallel>, #tpu.dimension_semantics<parallel>, #tpu.dimension_semantics<arbitrary>], iteration_bounds = array<i64: 1, 1, 1>, scalar_prefetch = 0 : i64, scratch_operands = 1 : i64, tpu.core_type = #tpu.core_type<tc>, window_params = [{transform_indices = @transform_0, window_bounds = array<i64: 16, 32>}, {transform_indices = @transform_1, window_bounds = array<i64: 32, 60>}, {transform_indices = @transform_2, window_bounds = array<i64: 1, 60>}, {transform_indices = @transform_3, window_bounds = array<i64: 16, 60>}]} {
    %c0_i32 = arith.constant 0 : i32
    %0 = arith.cmpi eq, %arg2, %c0_i32 : i32
    %1 = arith.extui %0 : i1 to i32
    %c0_i32_0 = arith.constant 0 : i32
    %2 = arith.cmpi ne, %1, %c0_i32_0 : i32
    scf.if %2 {
      %cst_10 = arith.constant 0.000000e+00 : f32
      %12 = vector.broadcast %cst_10 : f32 to vector<16x60xf32>
      %c0_11 = arith.constant 0 : index
      %c0_12 = arith.constant 0 : index
      %13 = vector.load %arg7[%c0_11, %c0_12] : memref<16x60xf32, #tpu.memory_space<vmem>>, vector<16x60xf32>
      tpu.vector_store %arg7[%c0_11, %c0_12], %12 {strides = array<i32>} : memref<16x60xf32, #tpu.memory_space<vmem>>, vector<16x60xf32>,
    } else {
    }
    %c0 = arith.constant 0 : index
    %c0_1 = arith.constant 0 : index
    %3 = vector.load %arg7[%c0, %c0_1] : memref<16x60xf32, #tpu.memory_space<vmem>>, vector<16x60xf32>
    %c0_2 = arith.constant 0 : index
    %c0_3 = arith.constant 0 : index
    %4 = vector.load %arg3[%c0_2, %c0_3] : memref<16x32xbf16, #tpu.memory_space<vmem>>, vector<16x32xbf16>
    %c0_4 = arith.constant 0 : index
    %c0_5 = arith.constant 0 : index
    %5 = vector.load %arg4[%c0_4, %c0_5] : memref<32x60xbf16, #tpu.memory_space<vmem>>, vector<32x60xbf16>
    %cst = arith.constant dense<0.000000e+00> : vector<16x60xf32>
    %6 = tpu.matmul %4, %5, %cst {dimension_numbers = #tpu.dot_dimension_numbers<[1], [0], [0], [1], [0, 0, 1, 1], [], []>} : vector<16x32xbf16>, vector<32x60xbf16>, vector<16x60xf32> -> vector<16x60xf32>
    %7 = arith.addf %3, %6 : vector<16x60xf32>
    %c0_6 = arith.constant 0 : index
    %c0_7 = arith.constant 0 : index
    %8 = vector.load %arg7[%c0_6, %c0_7] : memref<16x60xf32, #tpu.memory_space<vmem>>, vector<16x60xf32>
    tpu.vector_store %arg7[%c0_6, %c0_7], %7 {strides = array<i32>} : memref<16x60xf32, #tpu.memory_space<vmem>>, vector<16x60xf32>,
    %c0_i32_8 = arith.constant 0 : i32
    %9 = arith.cmpi eq, %arg2, %c0_i32_8 : i32
    %10 = arith.extui %9 : i1 to i32
    %c0_i32_9 = arith.constant 0 : i32
    %11 = arith.cmpi ne, %10, %c0_i32_9 : i32
    scf.if %11 {
      %c0_10 = arith.constant 0 : index
      %c0_11 = arith.constant 0 : index
      %12 = vector.load %arg7[%c0_10, %c0_11] : memref<16x60xf32, #tpu.memory_space<vmem>>, vector<16x60xf32>
      %c0_12 = arith.constant 0 : index
      %c0_13 = arith.constant 0 : index
      %13 = vector.load %arg5[%c0_12, %c0_13] : memref<1x60xf32, #tpu.memory_space<vmem>>, vector<1x60xf32>
      %14 = vector.broadcast %13 : vector<1x60xf32> to vector<16x60xf32>
      %15 = arith.addf %12, %14 : vector<16x60xf32>
      %c0_14 = arith.constant 0 : index
      %c0_15 = arith.constant 0 : index
      %16 = vector.load %arg6[%c0_14, %c0_15] : memref<16x60xf32, #tpu.memory_space<vmem>>, vector<16x60xf32>
      tpu.vector_store %arg6[%c0_14, %c0_15], %15 {strides = array<i32>} : memref<16x60xf32, #tpu.memory_space<vmem>>, vector<16x60xf32>,
    } else {
    }
    return
  }
  func.func @transform_0(%arg0: i32, %arg1: i32, %arg2: i32) -> (i32, i32) {
    %c0_i32 = arith.constant 0 : i32
    return %arg0, %arg2 : i32, i32
  }
  func.func @transform_1(%arg0: i32, %arg1: i32, %arg2: i32) -> (i32, i32) {
    %c0_i32 = arith.constant 0 : i32
    return %arg2, %arg1 : i32, i32
  }
  func.func @transform_2(%arg0: i32, %arg1: i32, %arg2: i32) -> (i32, i32) {
    %c0_i32 = arith.constant 0 : i32
    %c0_i32_0 = arith.constant 0 : i32
    return %c0_i32, %arg1 : i32, i32
  }
  func.func @transform_3(%arg0: i32, %arg1: i32, %arg2: i32) -> (i32, i32) {
    %c0_i32 = arith.constant 0 : i32
    return %arg0, %arg1 : i32, i32
  }
}

</mosaic_0001>

<bundles_post_ra>
// kernel: transformer_forward.41
= control target key start
LH: loop header
LB: loop body
LE: loop exit
PB: predicated region body
PF: predicated region fallthrough
CT: control target
= control target key end

     0   :  { %vm19_vm0 = vcmask 261120   ;;  %v137_v0 = vmov 0.0   ;;  %vm138_vm1 = vmmov 0   ;;  %s184_s1 = inlined_call_operand.vmem [shape: bf16[32,32], index: 1, kind: input, shape index: {}]   ;;  %s185_s0 = inlined_call_operand.vmem [shape: bf16[16,32], index: 0, kind: input, shape index: {}]   ;;  %s186_s2 = inlined_call_operand.vmem [shape: f32[1,32], index: 2, kind: input, shape index: {}]   ;;  %s187_s3 = inlined_call_operand.vmem [shape: f32[16,32], index: 3, kind: output, shape index: {}]  }
   0x1   :  { %124 = vmatprep.subr.bf16.mxu0 %v137_v0  ;;  %v134_v1 = vld [vmem:[%s184_s1] sm:$0xff]   ;;  %128 = vmatprep.mubr.msk.bf16.mxu0 %vm138_vm1, %v137_v0  ;;  %20 = vst.msk [vmem:[#allocation2] sm:$0xff] %vm19_vm0, %v137_v0  ;;  %21 = vst.msk [vmem:[#allocation2 + $0x8] sm:$0xff] %vm19_vm0, %v137_v0  ;;  %v135_v2 = vld [vmem:[%s184_s1 + $0x8] sm:$0xff]  }
   0x2   :  { %125 = vmatpush3.bf16.msra.mxu0 %v134_v1  ;;  %v136_v3 = vld [vmem:[%s185_s0] sm:$0xff]  }
   0x3   :  { %126 = vmatprep.subr.bf16.mxu0 %v137_v0  ;;  %v120_v12 = vld [vmem:[%s186_s2] ss:$0 sm:$0xff] }
   0x6   :  { %127 = vmatpush3.bf16.msra.mxu0 %v135_v2 }
   0x8   :  { %v22_v4 = vld [vmem:[#allocation2] sm:$0xff]  ;;  %v23_v6 = vld [vmem:[#allocation2 + $0x8] sm:$0xff] }
   0x9   :  { %129 = vmatmul.mubr.msk.bf16.vlgmr.msra.gmra.mrb[0].mxu0 %vm19_vm0, %v136_v3 }
  0xdc   :  { %v85_v5 = vpop.f32.mrb[0].mxu0 }
  0xdd   :  { %v92_v7 = vadd.f32 %v85_v5, %v22_v4  ;;  %v130_v8 = vpop.f32.mrb[1].mxu0 }
  0xde   :  { %v88_v9 = vpop.f32.mrb[2].mxu0 }
  0xdf   :  { %94 = vst.msk [vmem:[#allocation2] sm:$0xff] %vm19_vm0, %v92_v7  ;;  %v93_v10 = vadd.f32 %v88_v9, %v23_v6  ;;  %v131_v11 = vpop.f32.mrb[3].mxu0 }
  0xe1   :  { %95 = vst.msk [vmem:[#allocation2 + $0x8] sm:$0xff] %vm19_vm0, %v93_v10 }
  0xe6   :  { %v99_v13 = vld [vmem:[#allocation2] sm:$0xff] }
  0xe7   :  { %v108_v14 = vadd.f32 %v120_v12, %v99_v13 }
  0xe8   :  { %v100_v15 = vld [vmem:[#allocation2 + $0x8] sm:$0xff] }
  0xe9   :  { %110 = vst.msk [vmem:[%s187_s3] sm:$0xff] %vm19_vm0, %v108_v14  ;;  %v109_v16 = vadd.f32 %v120_v12, %v100_v15 }
  0xeb   :  { %111 = vst.msk [vmem:[%s187_s3 + $0x8] sm:$0xff] %vm19_vm0, %v109_v16 }

// kernel: transformer_forward.39
= control target key start
LH: loop header
LB: loop body
LE: loop exit
PB: predicated region body
PF: predicated region fallthrough
CT: control target
= control target key end

     0   :  { %vm19_vm0 = vcmask 785408   ;;  %v151_v0 = vmov 0.0   ;;  %vm152_vm1 = vmmov 0   ;;  %vm47_vm2 = vcmask 261120   ;;  %s195_s1 = inlined_call_operand.vmem [shape: bf16[32,96], index: 1, kind: input, shape index: {}]   ;;  %s196_s0 = inlined_call_operand.vmem [shape: bf16[16,32], index: 0, kind: input, shape index: {}]   ;;  %s197_s2 = inlined_call_operand.vmem [shape: f32[1,96], index: 2, kind: input, shape index: {}]   ;;  %s198_s3 = inlined_call_operand.vmem [shape: bf16[16,96], index: 3, kind: output, shape index: {}]  }
   0x1   :  { %138 = vmatprep.subr.bf16.mxu0 %v151_v0  ;;  %v148_v1 = vld [vmem:[%s195_s1] sm:$0xff]   ;;  %142 = vmatprep.mubr.msk.bf16.mxu0 %vm152_vm1, %v151_v0  ;;  %20 = vst.msk [vmem:[#allocation2] sm:$0xff] %vm19_vm0, %v151_v0  ;;  %21 = vst.msk [vmem:[#allocation2 + $0x8] sm:$0xff] %vm19_vm0, %v151_v0  ;;  %v149_v2 = vld [vmem:[%s195_s1 + $0x8] sm:$0xff]   ;;  %vm119_vm3 = vcmask 781312  }
   0x2   :  { %139 = vmatpush3.bf16.msra.mxu0 %v148_v1  ;;  %v150_v3 = vld [vmem:[%s196_s0] sm:$0xff]  }
   0x3   :  { %140 = vmatprep.subr.bf16.mxu0 %v151_v0  ;;  %v130_v12 = vld [vmem:[%s197_s2] ss:$0 sm:$0xff] }
   0x6   :  { %141 = vmatpush3.bf16.msra.mxu0 %v149_v2 }
   0x8   :  { %v22_v4 = vld [vmem:[#allocation2] sm:$0xff]  ;;  %v23_v6 = vld [vmem:[#allocation2 + $0x8] sm:$0xff] }
   0x9   :  { %143 = vmatmul.mubr.msk.bf16.vlgmr.msra.gmra.mrb[0].mxu0 %vm47_vm2, %v150_v3 }
  0xdc   :  { %v85_v5 = vpop.f32.mrb[0].mxu0 }
  0xdd   :  { %v92_v7 = vadd.f32 %v85_v5, %v22_v4  ;;  %v144_v8 = vpop.f32.mrb[1].mxu0 }
  0xde   :  { %v88_v9 = vpop.f32.mrb[2].mxu0 }
  0xdf   :  { %95 = vst.msk [vmem:[#allocation2] sm:$0xff] %vm19_vm0, %v92_v7  ;;  %v93_v10 = vadd.f32 %v88_v9, %v23_v6  ;;  %v145_v11 = vpop.f32.mrb[3].mxu0 }
  0xe1   :  { %96 = vst.msk [vmem:[#allocation2 + $0x8] sm:$0xff] %vm19_vm0, %v93_v10 }
  0xe6   :  { %v100_v13 = vld [vmem:[#allocation2] sm:$0xff] }
  0xe7   :  { %v109_v14 = vadd.f32 %v130_v12, %v100_v13 }
  0xe8   :  { %v101_v15 = vld [vmem:[#allocation2 + $0x8] sm:$0xff] }
  0xe9   :  { %v133_v16 = vpack.c.bf16 %v109_v14, %v109_v14  ;;  %v110_v17 = vadd.f32 %v130_v12, %v101_v15 }
  0xeb   :  { %120 = vst.msk [vmem:[%s198_s3] sm:$0xf] %vm119_vm3, %v133_v16  ;;  %v134_v18 = vpack.c.bf16 %v110_v17, %v110_v17 }
  0xed   :  { %121 = vst.msk [vmem:[%s198_s3 + $0x4] sm:$0xf] %vm119_vm3, %v134_v18 }

// kernel: transformer_forward.42
= control target key start
LH: loop header
LB: loop body
LE: loop exit
PB: predicated region body
PF: predicated region fallthrough
CT: control target
= control target key end

     0   :  { %vm23_vm0 = vcmask 261120   ;;  %s136_s0 = inlined_call_operand.vmem [shape: f32[16,32], index: 0, kind: input, shape index: {}]   ;;  %s137_s1 = inlined_call_operand.vmem [shape: f32[16,32], index: 1, kind: input, shape index: {}]   ;;  %s138_s2 = inlined_call_operand.vmem [shape: f32[1,32], index: 2, kind: input, shape index: {}]   ;;  %s139_s3 = inlined_call_operand.vmem [shape: f32[1,32], index: 3, kind: input, shape index: {}]   ;;  %s140_s4 = inlined_call_operand.vmem [shape: f32[16,32], index: 4, kind: output, shape index: {}]  }
   0x1   :  { %v17_v0 = vld [vmem:[%s136_s0] sm:$0xff]  ;;  %v18_v2 = vld [vmem:[%s136_s0 + $0x8] sm:$0xff] }
   0x2   :  { %v19_v1 = vld [vmem:[%s137_s1] sm:$0xff]  ;;  %v20_v4 = vld [vmem:[%s137_s1 + $0x8] sm:$0xff] }
   0x3   :  { %v21_v3 = vadd.f32 %v19_v1, %v17_v0  ;;  %v22_v5 = vadd.f32 %v20_v4, %v18_v2  ;;  %v75_v25 = vld [vmem:[%s138_s2] ss:$0 sm:$0xff] }
   0x4   :  { %v76_v27 = vld [vmem:[%s139_s3] ss:$0 sm:$0xff] }
   0x5   :  { %v24_v6 = vsel %vm23_vm0, %v21_v3, 0.0  ;;  %v27_v7 = vsel %vm23_vm0, %v22_v5, 0.0 }
   0x6   :  { %25 = vadd.xlane.f32.xlu0 %v24_v6 }
   0xa   :  { %28 = vadd.xlane.f32.xlu0 %v27_v7 }
  0x93   :  { %v26_v8 = vpop.xlane.xlu0 %25 }
  0x94   :  { %v31_v9 = vmul.f32 0.03125, %v26_v8 }
  0x96   :  { %v33_v10 = vsub.f32 %v21_v3, %v31_v9 }
  0x97   :  { %v29_v11 = vpop.xlane.xlu0 %28 }
  0x98   :  { %v32_v12 = vmul.f32 0.03125, %v29_v11  ;;  %v35_v13 = vmul.f32 %v33_v10, %v33_v10 }
  0x9a   :  { %v34_v14 = vsub.f32 %v22_v5, %v32_v12  ;;  %v37_v15 = vsel %vm23_vm0, %v35_v13, 0.0 }
  0x9b   :  { %38 = vadd.xlane.f32.xlu1 %v37_v15 }
  0x9c   :  { %v36_v16 = vmul.f32 %v34_v14, %v34_v14 }
  0x9e   :  { %v40_v17 = vsel %vm23_vm0, %v36_v16, 0.0 }
  0x9f   :  { %41 = vadd.xlane.f32.xlu1 %v40_v17 }
 0x128   :  { %v39_v18 = vpop.xlane.xlu1 %38 }
 0x129   :  { %v43_v19 = vmul.f32 0.03125, %v39_v18 }
 0x12b   :  { %v45_v20 = vadd.f32 1e-12, %v43_v19 }
 0x12c   :  { %v42_v21 = vpop.xlane.xlu1 %41 }
 0x12d   :  { %77 = vrsqrt.f32 %v45_v20  ;;  %v44_v22 = vmul.f32 0.03125, %v42_v21 }
 0x12f   :  { %v46_v23 = vadd.f32 1e-12, %v44_v22 }
 0x131   :  { %79 = vrsqrt.f32 %v46_v23 }
 0x137   :  { %v78_v24 = vpop.eup %77 }
 0x138   :  { %v49_v26 = vmul.f32 %v78_v24, %v33_v10 }
 0x13a   :  { %v58_v28 = vmul.f32 %v75_v25, %v49_v26 }
 0x13b   :  { %v80_v29 = vpop.eup %79 }
 0x13c   :  { %v67_v30 = vadd.f32 %v76_v27, %v58_v28  ;;  %v50_v31 = vmul.f32 %v80_v29, %v34_v14 }
 0x13e   :  { %69 = vst.msk [vmem:[%s140_s4] sm:$0xff] %vm23_vm0, %v67_v30  ;;  %v59_v32 = vmul.f32 %v75_v25, %v50_v31 }
 0x140   :  { %v68_v33 = vadd.f32 %v76_v27, %v59_v32 }
 0x142   :  { %70 = vst.msk [vmem:[%s140_s4 + $0x8] sm:$0xff] %vm23_vm0, %v68_v33 }

// kernel: transformer_forward.40
= control target key start
LH: loop header
LB: loop body
LE: loop exit
PB: predicated region body
PF: predicated region fallthrough
CT: control target
= control target key end

     0   :  { %s1040_s18 = smov 0   ;;  %s1135_s0 = inlined_call_operand.vmem [shape: bf16[2,4,8,8], index: 0, kind: input, shape index: {}]   ;;  %s1136_s1 = inlined_call_operand.vmem [shape: bf16[2,4,8,8], index: 1, kind: input, shape index: {}]   ;;  %s1137_s2 = inlined_call_operand.vmem [shape: bf16[2,4,8,8], index: 2, kind: input, shape index: {}]   ;;  %s1138_s3 = inlined_call_operand.vmem [shape: f32[2,8,1], index: 3, kind: input, shape index: {}]   ;;  %s1139_s4 = inlined_call_operand.vmem [shape: f32[2,1,8], index: 4, kind: input, shape index: {}]   ;;  %s1140_s5 = inlined_call_operand.vmem [shape: bf16[2,4,8,8], index: 5, kind: output, shape index: {}]  }
   0x1 LB: > { %s870_s19 = sadd.s32 4294967295, %s1005_s18   ;;  %p874_p0 = scmp.ge.s32.totalorder %s1005_s18, 1  ;;  %s1005_s18 = sphi %s1040_s18, %s15_s18  }
   0x2   : > { %p224_p1 = scmp.lt.s32.totalorder %s1005_s18, 3 }
   0x4   : > { %p225_p2 = pnand %p874_p0, %p224_p1 }
   0x5   : > { %p269_p3 = scmp.lt.s32.totalorder (!%p225_p2), %s870_s19, 1  ;;  %v1007_v0 = vmov (!%p225_p2), 0.0   ;;  %vm1008_vm0 = vmmov (!%p225_p2), 0   ;;  %v1009_v1 = vmov (!%p225_p2), 0   ;;  %vm321_vm1 = vcmask (!%p225_p2), 64512  }
   0x6   : > { %228 = sbr.rel (%p225_p2) target bundleno = 781 (0x30d), region = 40  ;;  %923 = vmatprep.subr.bf16.mxu0 (!%p225_p2), %v1007_v0  ;;  %929 = vmatprep.subr.bf16.mxu1 (!%p225_p2), %v1007_v0  ;;  %v516_v28 = vlaneseq (!%p225_p2)  ;;  %vm579_vm7 = vcmask (!%p225_p2), 1043456   ;;  %vm765_vm8 = vcmask (!%p225_p2), 60416  }
   0x7   : > { %925 = vmatprep.mubr.msk.bf16.mxu0 (!%p225_p2), %vm1008_vm0, %v1007_v0  ;;  %931 = vmatprep.mubr.msk.bf16.mxu1 (!%p225_p2), %vm1008_vm0, %v1007_v0 }
   0x8   : > { %982 = vset.pattern.permute.xlu0 (!%p225_p2), %v1009_v1  ;;  %v517_v29 = vshrl.u32 (!%p225_p2), %v516_v28, 7 }
   0xa   : > { %v518_v30 = vsub.s32 (!%p225_p2), 0, %v517_v29 }
   0xd   : > { %s1144_s19 = smov (!%p269_p3, %s870_s19), 1 }
   0xe   : > { %s1054_s20 = sshll.u32 %s1144_s19, 4  ;;  %s881_s21 = sshll.u32 %s1144_s19, 3 }
   0xf   : > { %s278_s24 = scalar_lea.vmem %s1136_s1, %s1054_s20  ;;  %s273_s27 = scalar_lea.vmem %s1135_s0, %s1054_s20 }
  0x10   : > { %v313_v2 = vld [vmem:[%s278_s24] sm:$0xf]  ;;  %v314_v3 = vld [vmem:[%s278_s24 + $0x4] sm:$0xf]  ;;  %s287_s30 = scalar_lea.vmem %s1138_s3, %s881_s21  ;;  %s290_s8 = scalar_lea.vmem %s1139_s4, %s1144_s19  ;;  %v906_v8 = vld [vmem:[%s273_s27 + $0x8] sm:$0xff]  }
  0x11   : > { %v899_v4 = vld [vmem:[%s273_s27] sm:$0xff]   ;;  %v326_v5 = vsel %vm321_vm1, %v313_v2, 0  ;;  %v372_v6 = vsel %vm321_vm1, %v314_v3, 0  ;;  %v904_v15 = vunpack.c.l.bf16 %v906_v8  ;;  %v315_v16 = vld [vmem:[%s278_s24 + $0x8] sm:$0xf]  ;;  %v905_v18 = vunpack.c.h.bf16 %v906_v8  ;;  %s283_s11 = scalar_lea.vmem %s1137_s2, %s1054_s20  ;;  %s295_s14 = scalar_lea.vmem %s1140_s5, %s1054_s20 }
  0x12   : > { %v900_v7 = vunpack.c.l.bf16 %v899_v4  ;;  %v901_v9 = vunpack.c.h.bf16 %v899_v4  ;;  %v506_v10 = vld [vmem:[%s287_s30] sm:$0xff]  ;;  %924 = vmatpush3.bf16.xpose.msra.mxu0 %v326_v5  ;;  %930 = vmatpush3.bf16.xpose.msra.mxu1 %v372_v6  ;;  %v316_v17 = vld [vmem:[%s278_s24 + $0xc] sm:$0xf]  ;;  %v418_v22 = vsel %vm321_vm1, %v315_v16, 0 }
  0x13   : > { %vm507_vm2 = vcmp.gt.f32.partialorder %v506_v10, 0.5  ;;  %v508_v11 = vld [vmem:[%s290_s8] sm:$0x1]  ;;  %935 = vmatprep.subr.bf16.mxu0 %v1007_v0  ;;  %941 = vmatprep.subr.bf16.mxu1 %v1007_v0  ;;  %v464_v23 = vsel %vm321_vm1, %v316_v17, 0  ;;  %v307_v24 = vmul.f32 0.35355338, %v904_v15 }
  0x14   : > { %v305_v12 = vmul.f32 0.35355338, %v900_v7  ;;  %v306_v13 = vmul.f32 0.35355338, %v901_v9  ;;  %v510_v14 = vsel %vm507_vm2, 1, %v1009_v1  ;;  %vm509_vm3 = vcmp.gt.f32.partialorder %v508_v11, 0.5 }
  0x15   : > { %512 = vperm.xlu0 %982, %v510_v14   ;;  %v515_v21 = vsel %vm509_vm3, 1, %v1009_v1  ;;  %v308_v25 = vmul.f32 0.35355338, %v905_v18  ;;  %v311_v26 = vpack.c.bf16 %v307_v24, %v307_v24  ;;  %v317_v15 = vld [vmem:[%s283_s11] sm:$0xf] }
  0x16   : > { %v309_v19 = vpack.c.bf16 %v305_v12, %v305_v12  ;;  %v310_v20 = vpack.c.bf16 %v306_v13, %v306_v13  ;;  %v519_v31 = vrot.slane %v515_v21, %v518_v30  ;;  %v581_v16 = vsel %vm579_vm7, %v317_v15, 0  ;;  %v318_v17 = vld [vmem:[%s283_s11 + $0x4] sm:$0xf]  ;;  %v320_v21 = vld [vmem:[%s283_s11 + $0xc] sm:$0xf] }
  0x17   : > { %v312_v27 = vpack.c.bf16 %v308_v25, %v308_v25  ;;  %v627_v18 = vsel %vm579_vm7, %v318_v17, 0 }
  0x18   : > { %vm520_vm4 = vcmp.eq.s32.totalorder %v519_v31, 1 }
  0x19   : > { %926 = vmatmul.mubr.msk.bf16.vlgmr.msra.gmra.mrb[0].mxu0 %vm321_vm1, %v309_v19  ;;  %932 = vmatmul.mubr.msk.bf16.vlgmr.msra.gmra.mrb[0].mxu1 %vm321_vm1, %v310_v20  ;;  %v319_v19 = vld [vmem:[%s283_s11 + $0x8] sm:$0xf] }
  0x1a   : > { %936 = vmatpush3.bf16.xpose.msra.mxu0 %v418_v22  ;;  %942 = vmatpush3.bf16.xpose.msra.mxu1 %v464_v23  ;;  %v673_v20 = vsel %vm579_vm7, %v319_v19, 0  ;;  %v719_v22 = vsel %vm579_vm7, %v320_v21, 0 }
  0x1b   : > { %937 = vmatprep.mubr.msk.bf16.mxu0 %vm1008_vm0, %v1007_v0  ;;  %943 = vmatprep.mubr.msk.bf16.mxu1 %vm1008_vm0, %v1007_v0 }
  0x1c   : > { %947 = vmatprep.subr.bf16.mxu0 %v1007_v0  ;;  %953 = vmatprep.subr.bf16.mxu1 %v1007_v0 }
  0x21   : > { %938 = vmatmul.mubr.msk.bf16.vlgmr.msra.gmra.mrb[4].mxu0 %vm321_vm1, %v311_v26  ;;  %944 = vmatmul.mubr.msk.bf16.vlgmr.msra.gmra.mrb[4].mxu1 %vm321_vm1, %v312_v27 }
  0x22   : > { %949 = vmatprep.mubr.msk.bf16.mxu0 %vm1008_vm0, %v1007_v0  ;;  %955 = vmatprep.mubr.msk.bf16.mxu1 %vm1008_vm0, %v1007_v0 }
  0x23   : > { %948 = vmatpush3.bf16.msra.mxu0 %v581_v16  ;;  %954 = vmatpush3.bf16.msra.mxu1 %v627_v18 }
  0x24   : > { %959 = vmatprep.subr.bf16.mxu0 %v1007_v0  ;;  %965 = vmatprep.subr.bf16.mxu1 %v1007_v0 }
  0x94   : > { %v513_v32 = vpop.permute.xlu0 %512 }
  0x95   : > { %vm514_vm5 = vcmp.eq.s32.totalorder %v513_v32, 1 }
  0x96   : > { %vm1090_vm6 = vmand %vm514_vm5, %vm520_vm4 }
  0xec   : > { %v362_v34 = vpop.f32.mrb[0].mxu0  ;;  %v408_v35 = vpop.f32.mrb[0].mxu1 }
  0xed   : > { %v524_v36 = vsel %vm1090_vm6, %v362_v34, -10000.0  ;;  %v525_v37 = vsel %vm1090_vm6, %v408_v35, -10000.0  ;;  %v927_v38 = vpop.f32.mrb[1].mxu0  ;;  %v933_v39 = vpop.f32.mrb[1].mxu1 }
  0xee   : > { %v365_v40 = vpop.f32.mrb[2].mxu0  ;;  %v531_v41 = vsel %vm321_vm1, %v525_v37, -inf  ;;  %v528_v42 = vsel %vm321_vm1, %v524_v36, -inf  ;;  %v411_v43 = vpop.f32.mrb[2].mxu1 }
  0xef   : > { %532 = vmax.xlane.f32.xlu1 %v531_v41  ;;  %529 = vmax.xlane.f32.xlu0 %v528_v42  ;;  %v928_v44 = vpop.f32.mrb[3].mxu0  ;;  %v934_v45 = vpop.f32.mrb[3].mxu1 }
  0xf4   : > { %v454_v46 = vpop.f32.mrb[4].mxu0  ;;  %v500_v47 = vpop.f32.mrb[4].mxu1 }
  0xf5   : > { %v526_v48 = vsel %vm1090_vm6, %v454_v46, -10000.0  ;;  %v527_v49 = vsel %vm1090_vm6, %v500_v47, -10000.0  ;;  %v939_v50 = vpop.f32.mrb[5].mxu0  ;;  %v945_v51 = vpop.f32.mrb[5].mxu1 }
  0xf6   : > { %v457_v52 = vpop.f32.mrb[6].mxu0  ;;  %v534_v53 = vsel %vm321_vm1, %v526_v48, -inf  ;;  %v503_v54 = vpop.f32.mrb[6].mxu1  ;;  %v537_v57 = vsel %vm321_vm1, %v527_v49, -inf }
  0xf7   : > { %535 = vmax.xlane.f32.xlu1 %v534_v53  ;;  %v940_v55 = vpop.f32.mrb[7].mxu0  ;;  %v946_v56 = vpop.f32.mrb[7].mxu1 }
  0xfb   : > { %538 = vmax.xlane.f32.xlu1 %v537_v57 }
 0x17c   : > { %v533_v58 = vpop.xlane.xlu1 %532  ;;  %v530_v59 = vpop.xlane.xlu0 %529 }
 0x17d   : > { %v541_v60 = vsub.f32 %v525_v37, %v533_v58  ;;  %v540_v61 = vsub.f32 %v524_v36, %v530_v59 }
 0x17f   : > { %v544_v62 = vmul.f32 1.442695, %v540_v61  ;;  %v546_v63 = vmul.f32 1.442695, %v541_v60 }
 0x181   : > { %983 = vpow2.f32 %v544_v62 }
 0x182   : > { %985 = vpow2.f32 %v546_v63 }
 0x184   : > { %v536_v1 = vpop.xlane.xlu1 %535 }
 0x185   : > { %v542_v2 = vsub.f32 %v526_v48, %v536_v1 }
 0x187   : > { %v548_v3 = vmul.f32 1.442695, %v542_v2 }
 0x188   : > { %v539_v4 = vpop.xlane.xlu1 %538 }
 0x189   : > { %987 = vpow2.f32 %v548_v3  ;;  %v543_v5 = vsub.f32 %v527_v49, %v539_v4 }
 0x18b   : > { %v550_v6 = vmul.f32 1.442695, %v543_v5  ;;  %v984_v7 = vpop.eup %983 }
 0x18c   : > { %v552_v8 = vsel %vm321_vm1, %v984_v7, 0.0  ;;  %v986_v9 = vpop.eup %985 }
 0x18d   : > { %989 = vpow2.f32 %v550_v6  ;;  %553 = vadd.xlane.f32.xlu1 %v552_v8  ;;  %v555_v10 = vsel %vm321_vm1, %v986_v9, 0.0 }
 0x191   : > { %556 = vadd.xlane.f32.xlu1 %v555_v10 }
 0x193   : > { %v988_v11 = vpop.eup %987 }
 0x194   : > { %v558_v12 = vsel %vm321_vm1, %v988_v11, 0.0 }
 0x195   : > { %559 = vadd.xlane.f32.xlu1 %v558_v12 }
 0x197   : > { %v990_v13 = vpop.eup %989 }
 0x198   : > { %v561_v14 = vsel %vm321_vm1, %v990_v13, 0.0 }
 0x199   : > { %562 = vadd.xlane.f32.xlu1 %v561_v14 }
 0x21a   : > { %v554_v23 = vpop.xlane.xlu1 %553 }
 0x21b   : > { %991 = vrcp.f32 %v554_v23 }
 0x21e   : > { %v557_v24 = vpop.xlane.xlu1 %556 }
 0x21f   : > { %993 = vrcp.f32 %v557_v24 }
 0x222   : > { %v560_v25 = vpop.xlane.xlu1 %559 }
 0x223   : > { %995 = vrcp.f32 %v560_v25 }
 0x225   : > { %v992_v26 = vpop.eup %991 }
 0x226   : > { %v568_v27 = vmul.f32 %v992_v26, %v984_v7  ;;  %v563_v28 = vpop.xlane.xlu1 %562 }
 0x227   : > { %997 = vrcp.f32 %v563_v28 }
 0x228   : > { %v572_v29 = vpack.c.bf16 %v568_v27, %v568_v27 }
 0x229   : > { %v994_v30 = vpop.eup %993 }
 0x22a   : > { %v569_v31 = vmul.f32 %v994_v30, %v986_v9  ;;  %950 = vmatmul.mubr.msk.bf16.vlgmr.msra.gmra.mrb[8].mxu0 %vm321_vm1, %v572_v29 }
 0x22b   : > { %960 = vmatpush3.bf16.msra.mxu0 %v673_v20  ;;  %961 = vmatprep.mubr.msk.bf16.mxu0 %vm1008_vm0, %v1007_v0 }
 0x22c   : > { %v573_v32 = vpack.c.bf16 %v569_v31, %v569_v31 }
 0x22d   : > { %v996_v33 = vpop.eup %995 }
 0x22e   : > { %v570_v34 = vmul.f32 %v996_v33, %v988_v11  ;;  %956 = vmatmul.mubr.msk.bf16.vlgmr.msra.gmra.mrb[8].mxu1 %vm321_vm1, %v573_v32 }
 0x22f   : > { %966 = vmatpush3.bf16.msra.mxu1 %v719_v22  ;;  %967 = vmatprep.mubr.msk.bf16.mxu1 %vm1008_vm0, %v1007_v0 }
 0x230   : > { %v574_v35 = vpack.c.bf16 %v570_v34, %v570_v34 }
 0x231   : > { %v998_v36 = vpop.eup %997 }
 0x232   : > { %v571_v37 = vmul.f32 %v998_v36, %v990_v13  ;;  %962 = vmatmul.mubr.msk.bf16.vlgmr.msra.gmra.mrb[12].mxu0 %vm321_vm1, %v574_v35 }
 0x234   : > { %v575_v38 = vpack.c.bf16 %v571_v37, %v571_v37 }
 0x236   : > { %968 = vmatmul.mubr.msk.bf16.vlgmr.msra.gmra.mrb[12].mxu1 %vm321_vm1, %v575_v38 }
 0x2fd   : > { %v617_v39 = vpop.f32.mrb[8].mxu0 }
 0x2fe   : > { %v761_v40 = vpack.c.bf16 %v617_v39, %v617_v39  ;;  %v951_v41 = vpop.f32.mrb[9].mxu0 }
 0x2ff   : > { %v620_v42 = vpop.f32.mrb[10].mxu0 }
 0x300   : > { %766 = vst.msk [vmem:[%s295_s14] sm:$0xf] %vm765_vm8, %v761_v40  ;;  %v952_v0 = vpop.f32.mrb[11].mxu0 }
 0x301   : > { %v663_v43 = vpop.f32.mrb[8].mxu1 }
 0x302   : > { %v762_v44 = vpack.c.bf16 %v663_v43, %v663_v43  ;;  %v957_v45 = vpop.f32.mrb[9].mxu1 }
 0x303   : > { %v666_v46 = vpop.f32.mrb[10].mxu1 }
 0x304   : > { %767 = vst.msk [vmem:[%s295_s14 + $0x4] sm:$0xf] %vm765_vm8, %v762_v44  ;;  %v958_v47 = vpop.f32.mrb[11].mxu1 }
 0x305   : > { %v709_v48 = vpop.f32.mrb[12].mxu0 }
 0x306   : > { %v763_v49 = vpack.c.bf16 %v709_v48, %v709_v48  ;;  %v963_v50 = vpop.f32.mrb[13].mxu0 }
 0x307   : > { %v712_v51 = vpop.f32.mrb[14].mxu0 }
 0x308   : > { %768 = vst.msk [vmem:[%s295_s14 + $0x8] sm:$0xf] %vm765_vm8, %v763_v49  ;;  %v964_v52 = vpop.f32.mrb[15].mxu0 }
 0x309   : > { %v755_v53 = vpop.f32.mrb[12].mxu1 }
 0x30a   : > { %v764_v54 = vpack.c.bf16 %v755_v53, %v755_v53  ;;  %v969_v55 = vpop.f32.mrb[13].mxu1 }
 0x30b   : > { %v758_v56 = vpop.f32.mrb[14].mxu1 }
 0x30c   : > { %769 = vst.msk [vmem:[%s295_s14 + $0xc] sm:$0xf] %vm765_vm8, %v764_v54  ;;  %v970_v57 = vpop.f32.mrb[15].mxu1 }
 0x30d PF: > { %s15_s18 = sadd.s32 1, %s1005_s18  }
 0x30e   : > { %p12_p4 = scmp.ge.s32.totalorder %s15_s18, 4  }
 0x310   :  { %14 = sbr.rel (!%p12_p4) target bundleno = 1 (0x1), region = 82 }

// kernel: transformer_forward.58
= control target key start
LH: loop header
LB: loop body
LE: loop exit
PB: predicated region body
PF: predicated region fallthrough
CT: control target
= control target key end

     0   :  { %vm19_vm0 = vcmask 523264   ;;  %v151_v0 = vmov 0.0   ;;  %vm152_vm1 = vmmov 0   ;;  %vm47_vm2 = vcmask 261120   ;;  %s195_s1 = inlined_call_operand.vmem [shape: bf16[32,64], index: 1, kind: input, shape index: {}]   ;;  %s196_s0 = inlined_call_operand.vmem [shape: bf16[16,32], index: 0, kind: input, shape index: {}]   ;;  %s197_s2 = inlined_call_operand.vmem [shape: f32[1,64], index: 2, kind: input, shape index: {}]   ;;  %s198_s3 = inlined_call_operand.vmem [shape: bf16[16,64], index: 3, kind: output, shape index: {}]  }
   0x1   :  { %138 = vmatprep.subr.bf16.mxu0 %v151_v0  ;;  %v148_v1 = vld [vmem:[%s195_s1] sm:$0xff]   ;;  %142 = vmatprep.mubr.msk.bf16.mxu0 %vm152_vm1, %v151_v0  ;;  %20 = vst.msk [vmem:[#allocation2] sm:$0xff] %vm19_vm0, %v151_v0  ;;  %21 = vst.msk [vmem:[#allocation2 + $0x8] sm:$0xff] %vm19_vm0, %v151_v0  ;;  %v149_v2 = vld [vmem:[%s195_s1 + $0x8] sm:$0xff]   ;;  %vm119_vm3 = vcmask 519168  }
   0x2   :  { %139 = vmatpush3.bf16.msra.mxu0 %v148_v1  ;;  %v150_v3 = vld [vmem:[%s196_s0] sm:$0xff]  }
   0x3   :  { %140 = vmatprep.subr.bf16.mxu0 %v151_v0  ;;  %v130_v12 = vld [vmem:[%s197_s2] ss:$0 sm:$0xff] }
   0x6   :  { %141 = vmatpush3.bf16.msra.mxu0 %v149_v2 }
   0x8   :  { %v22_v4 = vld [vmem:[#allocation2] sm:$0xff]  ;;  %v23_v6 = vld [vmem:[#allocation2 + $0x8] sm:$0xff] }
   0x9   :  { %143 = vmatmul.mubr.msk.bf16.vlgmr.msra.gmra.mrb[0].mxu0 %vm47_vm2, %v150_v3 }
  0xdc   :  { %v85_v5 = vpop.f32.mrb[0].mxu0 }
  0xdd   :  { %v92_v7 = vadd.f32 %v85_v5, %v22_v4  ;;  %v144_v8 = vpop.f32.mrb[1].mxu0 }
  0xde   :  { %v88_v9 = vpop.f32.mrb[2].mxu0 }
  0xdf   :  { %95 = vst.msk [vmem:[#allocation2] sm:$0xff] %vm19_vm0, %v92_v7  ;;  %v93_v10 = vadd.f32 %v88_v9, %v23_v6  ;;  %v145_v11 = vpop.f32.mrb[3].mxu0 }
  0xe1   :  { %96 = vst.msk [vmem:[#allocation2 + $0x8] sm:$0xff] %vm19_vm0, %v93_v10 }
  0xe6   :  { %v100_v13 = vld [vmem:[#allocation2] sm:$0xff] }
  0xe7   :  { %v109_v14 = vadd.f32 %v130_v12, %v100_v13 }
  0xe8   :  { %v101_v15 = vld [vmem:[#allocation2 + $0x8] sm:$0xff] }
  0xe9   :  { %v133_v16 = vpack.c.bf16 %v109_v14, %v109_v14  ;;  %v110_v17 = vadd.f32 %v130_v12, %v101_v15 }
  0xeb   :  { %120 = vst.msk [vmem:[%s198_s3] sm:$0xf] %vm119_vm3, %v133_v16  ;;  %v134_v18 = vpack.c.bf16 %v110_v17, %v110_v17 }
  0xed   :  { %121 = vst.msk [vmem:[%s198_s3 + $0x4] sm:$0xf] %vm119_vm3, %v134_v18 }

// kernel: transformer_forward.44
= control target key start
LH: loop header
LB: loop body
LE: loop exit
PB: predicated region body
PF: predicated region fallthrough
CT: control target
= control target key end

     0   :  { %vm19_vm0 = vcmask 261120   ;;  %v164_v0 = vmov 0.0   ;;  %vm165_vm1 = vmmov 0   ;;  %vm63_vm2 = vcmask 523264   ;;  %s216_s1 = inlined_call_operand.vmem [shape: bf16[64,32], index: 1, kind: input, shape index: {}]   ;;  %s217_s0 = inlined_call_operand.vmem [shape: bf16[16,64], index: 0, kind: input, shape index: {}]   ;;  %s218_s2 = inlined_call_operand.vmem [shape: f32[1,32], index: 2, kind: input, shape index: {}]   ;;  %s219_s3 = inlined_call_operand.vmem [shape: f32[16,32], index: 3, kind: output, shape index: {}]  }
   0x1   :  { %145 = vmatprep.subr.bf16.mxu0 %v164_v0  ;;  %v159_v1 = vld [vmem:[%s216_s1] sm:$0xff]   ;;  %153 = vmatprep.mubr.msk.bf16.mxu0 %vm165_vm1, %v164_v0  ;;  %20 = vst.msk [vmem:[#allocation2] sm:$0xff] %vm19_vm0, %v164_v0  ;;  %21 = vst.msk [vmem:[#allocation2 + $0x8] sm:$0xff] %vm19_vm0, %v164_v0  ;;  %v160_v2 = vld [vmem:[%s216_s1 + $0x8] sm:$0xff]  }
   0x2   :  { %146 = vmatpush3.bf16.msra.mxu0 %v159_v1  ;;  %v161_v3 = vld [vmem:[%s216_s1 + $0x10] sm:$0xff]   ;;  %v162_v4 = vld [vmem:[%s216_s1 + $0x18] sm:$0xff]   ;;  %v163_v5 = vld [vmem:[%s217_s0] sm:$0xff]  }
   0x3   :  { %147 = vmatprep.subr.bf16.mxu0 %v164_v0  ;;  %v139_v14 = vld [vmem:[%s218_s2] ss:$0 sm:$0xff] }
   0x6   :  { %148 = vmatpush3.bf16.msra.mxu0 %v160_v2 }
   0x7   :  { %149 = vmatprep.subr.bf16.mxu0 %v164_v0 }
   0x8   :  { %v22_v6 = vld [vmem:[#allocation2] sm:$0xff]  ;;  %v23_v8 = vld [vmem:[#allocation2 + $0x8] sm:$0xff] }
   0xa   :  { %150 = vmatpush3.bf16.msra.mxu0 %v161_v3 }
   0xb   :  { %151 = vmatprep.subr.bf16.mxu0 %v164_v0 }
   0xe   :  { %152 = vmatpush3.bf16.msra.mxu0 %v162_v4 }
  0x11   :  { %154 = vmatmul.mubr.msk.bf16.vlgmr.msra.gmra.mrb[0].mxu0 %vm63_vm2, %v163_v5 }
  0xe4   :  { %v101_v7 = vpop.f32.mrb[0].mxu0 }
  0xe5   :  { %v108_v9 = vadd.f32 %v101_v7, %v22_v6  ;;  %v155_v10 = vpop.f32.mrb[1].mxu0 }
  0xe6   :  { %v104_v11 = vpop.f32.mrb[2].mxu0 }
  0xe7   :  { %111 = vst.msk [vmem:[#allocation2] sm:$0xff] %vm19_vm0, %v108_v9  ;;  %v109_v12 = vadd.f32 %v104_v11, %v23_v8  ;;  %v156_v13 = vpop.f32.mrb[3].mxu0 }
  0xe9   :  { %112 = vst.msk [vmem:[#allocation2 + $0x8] sm:$0xff] %vm19_vm0, %v109_v12 }
  0xee   :  { %v116_v15 = vld [vmem:[#allocation2] sm:$0xff] }
  0xef   :  { %v125_v16 = vadd.f32 %v139_v14, %v116_v15 }
  0xf0   :  { %v117_v17 = vld [vmem:[#allocation2 + $0x8] sm:$0xff] }
  0xf1   :  { %127 = vst.msk [vmem:[%s219_s3] sm:$0xff] %vm19_vm0, %v125_v16  ;;  %v126_v18 = vadd.f32 %v139_v14, %v117_v17 }
  0xf3   :  { %128 = vst.msk [vmem:[%s219_s3 + $0x8] sm:$0xff] %vm19_vm0, %v126_v18 }

// kernel: transformer_forward.43
= control target key start
LH: loop header
LB: loop body
LE: loop exit
PB: predicated region body
PF: predicated region fallthrough
CT: control target
= control target key end

     0   :  { %vm19_vm0 = vcmask 523264   ;;  %v153_v0 = vmov 0.0   ;;  %vm154_vm1 = vmmov 0   ;;  %vm47_vm2 = vcmask 261120   ;;  %s197_s1 = inlined_call_operand.vmem [shape: bf16[32,64], index: 1, kind: input, shape index: {}]   ;;  %s198_s0 = inlined_call_operand.vmem [shape: bf16[16,32], index: 0, kind: input, shape index: {}]   ;;  %s199_s2 = inlined_call_operand.vmem [shape: f32[1,64], index: 2, kind: input, shape index: {}]   ;;  %s200_s3 = inlined_call_operand.vmem [shape: bf16[16,64], index: 3, kind: output, shape index: {}]  }
   0x1   :  { %140 = vmatprep.subr.bf16.mxu0 %v153_v0  ;;  %v150_v1 = vld [vmem:[%s197_s1] sm:$0xff]   ;;  %144 = vmatprep.mubr.msk.bf16.mxu0 %vm154_vm1, %v153_v0  ;;  %20 = vst.msk [vmem:[#allocation2] sm:$0xff] %vm19_vm0, %v153_v0  ;;  %21 = vst.msk [vmem:[#allocation2 + $0x8] sm:$0xff] %vm19_vm0, %v153_v0  ;;  %v151_v2 = vld [vmem:[%s197_s1 + $0x8] sm:$0xff]   ;;  %vm121_vm3 = vcmask 519168  }
   0x2   :  { %141 = vmatpush3.bf16.msra.mxu0 %v150_v1  ;;  %v152_v3 = vld [vmem:[%s198_s0] sm:$0xff]  }
   0x3   :  { %142 = vmatprep.subr.bf16.mxu0 %v153_v0  ;;  %v132_v12 = vld [vmem:[%s199_s2] ss:$0 sm:$0xff] }
   0x6   :  { %143 = vmatpush3.bf16.msra.mxu0 %v151_v2 }
   0x8   :  { %v22_v4 = vld [vmem:[#allocation2] sm:$0xff]  ;;  %v23_v6 = vld [vmem:[#allocation2 + $0x8] sm:$0xff] }
   0x9   :  { %145 = vmatmul.mubr.msk.bf16.vlgmr.msra.gmra.mrb[0].mxu0 %vm47_vm2, %v152_v3 }
  0xdc   :  { %v85_v5 = vpop.f32.mrb[0].mxu0 }
  0xdd   :  { %v92_v7 = vadd.f32 %v85_v5, %v22_v4  ;;  %v146_v8 = vpop.f32.mrb[1].mxu0 }
  0xde   :  { %v88_v9 = vpop.f32.mrb[2].mxu0 }
  0xdf   :  { %95 = vst.msk [vmem:[#allocation2] sm:$0xff] %vm19_vm0, %v92_v7  ;;  %v93_v10 = vadd.f32 %v88_v9, %v23_v6  ;;  %v147_v11 = vpop.f32.mrb[3].mxu0 }
  0xe1   :  { %96 = vst.msk [vmem:[#allocation2 + $0x8] sm:$0xff] %vm19_vm0, %v93_v10 }
  0xe6   :  { %v100_v13 = vld [vmem:[#allocation2] sm:$0xff] }
  0xe7   :  { %v109_v14 = vadd.f32 %v132_v12, %v100_v13 }
  0xe8   :  { %v101_v15 = vld [vmem:[#allocation2 + $0x8] sm:$0xff] }
  0xe9   :  { %v111_v16 = vmax.f32 %v109_v14, 0.0  ;;  %v110_v17 = vadd.f32 %v132_v12, %v101_v15 }
  0xeb   :  { %v135_v18 = vpack.c.bf16 %v111_v16, %v111_v16  ;;  %v112_v19 = vmax.f32 %v110_v17, 0.0 }
  0xed   :  { %122 = vst.msk [vmem:[%s200_s3] sm:$0xf] %vm121_vm3, %v135_v18  ;;  %v136_v20 = vpack.c.bf16 %v112_v19, %v112_v19 }
  0xef   :  { %123 = vst.msk [vmem:[%s200_s3 + $0x4] sm:$0xf] %vm121_vm3, %v136_v20 }

// kernel: transformer_forward.57
= control target key start
LH: loop header
LB: loop body
LE: loop exit
PB: predicated region body
PF: predicated region fallthrough
CT: control target
= control target key end

     0   :  { %vm19_vm0 = vcmask 261120   ;;  %v150_v0 = vmov 0.0   ;;  %vm151_vm1 = vmmov 0   ;;  %vm118_vm2 = vcmask 257024   ;;  %s195_s1 = inlined_call_operand.vmem [shape: bf16[32,32], index: 1, kind: input, shape index: {}]   ;;  %s196_s0 = inlined_call_operand.vmem [shape: bf16[16,32], index: 0, kind: input, shape index: {}]   ;;  %s197_s2 = inlined_call_operand.vmem [shape: f32[1,32], index: 2, kind: input, shape index: {}]   ;;  %s198_s3 = inlined_call_operand.vmem [shape: bf16[16,32], index: 3, kind: output, shape index: {}]  }
   0x1   :  { %137 = vmatprep.subr.bf16.mxu0 %v150_v0  ;;  %v147_v1 = vld [vmem:[%s195_s1] sm:$0xff]   ;;  %141 = vmatprep.mubr.msk.bf16.mxu0 %vm151_vm1, %v150_v0  ;;  %20 = vst.msk [vmem:[#allocation2] sm:$0xff] %vm19_vm0, %v150_v0  ;;  %21 = vst.msk [vmem:[#allocation2 + $0x8] sm:$0xff] %vm19_vm0, %v150_v0  ;;  %v148_v2 = vld [vmem:[%s195_s1 + $0x8] sm:$0xff]  }
   0x2   :  { %138 = vmatpush3.bf16.msra.mxu0 %v147_v1  ;;  %v149_v3 = vld [vmem:[%s196_s0] sm:$0xff]  }
   0x3   :  { %139 = vmatprep.subr.bf16.mxu0 %v150_v0  ;;  %v129_v12 = vld [vmem:[%s197_s2] ss:$0 sm:$0xff] }
   0x6   :  { %140 = vmatpush3.bf16.msra.mxu0 %v148_v2 }
   0x8   :  { %v22_v4 = vld [vmem:[#allocation2] sm:$0xff]  ;;  %v23_v6 = vld [vmem:[#allocation2 + $0x8] sm:$0xff] }
   0x9   :  { %142 = vmatmul.mubr.msk.bf16.vlgmr.msra.gmra.mrb[0].mxu0 %vm19_vm0, %v149_v3 }
  0xdc   :  { %v85_v5 = vpop.f32.mrb[0].mxu0 }
  0xdd   :  { %v92_v7 = vadd.f32 %v85_v5, %v22_v4  ;;  %v143_v8 = vpop.f32.mrb[1].mxu0 }
  0xde   :  { %v88_v9 = vpop.f32.mrb[2].mxu0 }
  0xdf   :  { %94 = vst.msk [vmem:[#allocation2] sm:$0xff] %vm19_vm0, %v92_v7  ;;  %v93_v10 = vadd.f32 %v88_v9, %v23_v6  ;;  %v144_v11 = vpop.f32.mrb[3].mxu0 }
  0xe1   :  { %95 = vst.msk [vmem:[#allocation2 + $0x8] sm:$0xff] %vm19_vm0, %v93_v10 }
  0xe6   :  { %v99_v13 = vld [vmem:[#allocation2] sm:$0xff] }
  0xe7   :  { %v108_v14 = vadd.f32 %v129_v12, %v99_v13 }
  0xe8   :  { %v100_v15 = vld [vmem:[#allocation2 + $0x8] sm:$0xff] }
  0xe9   :  { %v132_v16 = vpack.c.bf16 %v108_v14, %v108_v14  ;;  %v109_v17 = vadd.f32 %v129_v12, %v100_v15 }
  0xeb   :  { %119 = vst.msk [vmem:[%s198_s3] sm:$0xf] %vm118_vm2, %v132_v16  ;;  %v133_v18 = vpack.c.bf16 %v109_v17, %v109_v17 }
  0xed   :  { %120 = vst.msk [vmem:[%s198_s3 + $0x4] sm:$0xf] %vm118_vm2, %v133_v18 }

// kernel: transformer_forward.77
= control target key start
LH: loop header
LB: loop body
LE: loop exit
PB: predicated region body
PF: predicated region fallthrough
CT: control target
= control target key end

     0   :  { %v178_v1 = vmov 0.0   ;;  %vm179_vm0 = vmmov 0   ;;  %vm20_vm1 = vcmask 490496   ;;  %s233_s0 = inlined_call_operand.vmem [shape: bf16[16,32], index: 0, kind: input, shape index: {}]   ;;  %s234_s1 = inlined_call_operand.vmem [shape: bf16[32,60], index: 1, kind: input, shape index: {}]   ;;  %s235_s2 = inlined_call_operand.vmem [shape: f32[1,60], index: 2, kind: input, shape index: {}]   ;;  %s236_s3 = inlined_call_operand.hbm [shape: f32[16,60], index: 3, kind: output, shape index: {}]  }
   0x1   :  { %v151_v0 = vld [vmem:[%s234_s1] sm:$0xff]   ;;  %138 = vmatprep.subr.bf16.mxu0 %v178_v1  ;;  %v152_v2 = vld [vmem:[%s234_s1 + $0x8] sm:$0xff]   ;;  %142 = vmatprep.mubr.msk.bf16.mxu0 %vm179_vm0, %v178_v1 }
   0x2   :  { %139 = vmatpush3.bf16.msra.mxu0 %v151_v0 }
   0x3   :  { %140 = vmatprep.subr.bf16.mxu0 %v178_v1 }
   0x4   :  { %8 = vsyncpa [#allocation4], 0  ;;  %21 = vst.msk [vmem:[#allocation2] sm:$0xff] %vm20_vm1, %v178_v1  ;;  %v153_v3 = vld [vmem:[%s233_s0] sm:$0xff]   ;;  %vm48_vm2 = vcmask 261120   ;;  %s180_s0 = smov [#allocation3]  }
   0x5   :  { %22 = vst.msk [vmem:[#allocation2 + $0x8] sm:$0xff] %vm20_vm1, %v178_v1  ;;  %v134_v12 = vld [vmem:[%s235_s2] ss:$0 sm:$0xff]  ;;  %s119_s19 = sshll.u32 %s180_s0, 4  ;;  %s120_s19 = int_to_ptr.vmem [resolvable:$true] %s119_s19 }
   0x6   :  { %141 = vmatpush3.bf16.msra.mxu0 %v152_v2  ;;  %s154_s20 = scalar_lea.vmem %s120_s19, 256  ;;  %p159_p1 = scmp.lt.s32.totalorder %s120_s19, %s120_s19 }
   0x7   :  { %p155_p0 = scmp.ne.s32.totalorder %s120_s19, %s154_s20  ;;  %p160_p2 = scmp.lt.s32.totalorder %s154_s20, %s154_s20 }
   0x9   :  { %143 = vmatmul.mubr.msk.bf16.vlgmr.msra.gmra.mrb[0].mxu0 %vm48_vm2, %v153_v3  ;;  %p161_p3 = por %p160_p2, %p159_p1 }
   0xb   :  { %v23_v4 = vld [vmem:[#allocation2] sm:$0xff]  ;;  %p162_p4 = pnand %p161_p3, %p155_p0 }
   0xc   :  { %v24_v6 = vld [vmem:[#allocation2 + $0x8] sm:$0xff] }
  0xdc   :  { %v86_v5 = vpop.f32.mrb[0].mxu0 }
  0xdd   :  { %v93_v7 = vadd.f32 %v86_v5, %v23_v4  ;;  %v144_v8 = vpop.f32.mrb[1].mxu0 }
  0xde   :  { %v89_v9 = vpop.f32.mrb[2].mxu0 }
  0xdf   :  { %96 = vst.msk [vmem:[#allocation2] sm:$0xff] %vm20_vm1, %v93_v7  ;;  %v94_v10 = vadd.f32 %v89_v9, %v24_v6  ;;  %v145_v11 = vpop.f32.mrb[3].mxu0 }
  0xe1   :  { %97 = vst.msk [vmem:[#allocation2 + $0x8] sm:$0xff] %vm20_vm1, %v94_v10 }
  0xe6   :  { %v101_v13 = vld [vmem:[#allocation2] sm:$0xff] }
  0xe7   :  { %v110_v14 = vadd.f32 %v134_v12, %v101_v13 }
  0xe8   :  { %v102_v15 = vld [vmem:[#allocation2 + $0x8] sm:$0xff] }
  0xe9   :  { %v111_v16 = vadd.f32 %v134_v12, %v102_v15  ;;  %112 = vst.msk [vmem:[#allocation3] sm:$0xff] %vm20_vm1, %v110_v14 }
  0xeb   :  { %113 = vst.msk [vmem:[#allocation3 + $0x8] sm:$0xff] %vm20_vm1, %v111_v16 }
  0xec   :  { %165 = shalt.err (!%p162_p4)
}
  0xed   :  { %s166_s22 = scalar_lea.hbm %s236_s3, 256 }
  0xee   :  { %p167_p5 = scmp.ne.s32.totalorder %s236_s3, %s166_s22  ;;  %p170_p6 = scmp.lt.u32.totalorder %s166_s22, %s236_s3 }
  0xf0   :  { %p172_p7 = pnand %p170_p6, %p167_p5 }
  0xf2   :  { %175 = shalt.err (!%p172_p7)
}
  0xf3   :  { %s181_s27 = smov 128   ;;  %s182_s28 = smov 8  }
  0xf4   :  { %125 = dma.vmem_to_hbm [thread:$0]  %s120_s19, 256, %s236_s3, [#allocation4], %s181_s27, %s181_s27, %s182_s28  }
  0xf5   :  { %176 = dma.done.wait [#allocation4], 256  }
  0xf6   :  { %177 = vsyncadd [#allocation4], 4294967040 }
  0xf7   :  { %129 = vsyncpa [#allocation4], 1 }

// kernel: transformer_forward.54
= control target key start
LH: loop header
LB: loop body
LE: loop exit
PB: predicated region body
PF: predicated region fallthrough
CT: control target
= control target key end

     0   :  { %s1046_s18 = smov 0   ;;  %s1141_s0 = inlined_call_operand.vmem [shape: bf16[2,4,8,8], index: 0, kind: input, shape index: {}]   ;;  %s1142_s1 = inlined_call_operand.vmem [shape: bf16[2,4,8,8], index: 1, kind: input, shape index: {}]   ;;  %s1143_s2 = inlined_call_operand.vmem [shape: bf16[2,4,8,8], index: 2, kind: input, shape index: {}]   ;;  %s1144_s3 = inlined_call_operand.vmem [shape: f32[2,8,1], index: 3, kind: input, shape index: {}]   ;;  %s1145_s4 = inlined_call_operand.vmem [shape: f32[2,1,8], index: 4, kind: input, shape index: {}]   ;;  %s1146_s5 = inlined_call_operand.vmem [shape: bf16[2,4,8,8], index: 5, kind: output, shape index: {}]  }
   0x1 LB: > { %s876_s19 = sadd.s32 4294967295, %s1011_s18   ;;  %p880_p0 = scmp.ge.s32.totalorder %s1011_s18, 1  ;;  %s1011_s18 = sphi %s1046_s18, %s15_s18  }
   0x2   : > { %p224_p1 = scmp.lt.s32.totalorder %s1011_s18, 3 }
   0x4   : > { %p225_p2 = pnand %p880_p0, %p224_p1 }
   0x5   : > { %p269_p3 = scmp.lt.s32.totalorder (!%p225_p2), %s876_s19, 1  ;;  %v1013_v0 = vmov (!%p225_p2), 0.0   ;;  %vm1014_vm0 = vmmov (!%p225_p2), 0   ;;  %v1015_v1 = vmov (!%p225_p2), 0   ;;  %vm321_vm1 = vcmask (!%p225_p2), 64512  }
   0x6   : > { %228 = sbr.rel (%p225_p2) target bundleno = 781 (0x30d), region = 40  ;;  %929 = vmatprep.subr.bf16.mxu0 (!%p225_p2), %v1013_v0  ;;  %935 = vmatprep.subr.bf16.mxu1 (!%p225_p2), %v1013_v0  ;;  %v516_v28 = vlaneseq (!%p225_p2)  ;;  %vm585_vm9 = vcmask (!%p225_p2), 1043456   ;;  %vm771_vm10 = vcmask (!%p225_p2), 60416  }
   0x7   : > { %931 = vmatprep.mubr.msk.bf16.mxu0 (!%p225_p2), %vm1014_vm0, %v1013_v0  ;;  %937 = vmatprep.mubr.msk.bf16.mxu1 (!%p225_p2), %vm1014_vm0, %v1013_v0 }
   0x8   : > { %988 = vset.pattern.permute.xlu0 (!%p225_p2), %v1015_v1  ;;  %v517_v29 = vshrl.u32 (!%p225_p2), %v516_v28, 7  ;;  %v525_v33 = vand.u32 (!%p225_p2), 127, %v516_v28 }
   0xa   : > { %v518_v30 = vsub.s32 (!%p225_p2), 0, %v517_v29  ;;  %vm526_vm6 = vcmp.ge.s32.totalorder (!%p225_p2), %v517_v29, %v525_v33 }
   0xd   : > { %s1150_s19 = smov (!%p269_p3, %s876_s19), 1 }
   0xe   : > { %s1060_s20 = sshll.u32 %s1150_s19, 4  ;;  %s887_s21 = sshll.u32 %s1150_s19, 3 }
   0xf   : > { %s278_s24 = scalar_lea.vmem %s1142_s1, %s1060_s20  ;;  %s273_s27 = scalar_lea.vmem %s1141_s0, %s1060_s20 }
  0x10   : > { %v313_v2 = vld [vmem:[%s278_s24] sm:$0xf]  ;;  %v314_v3 = vld [vmem:[%s278_s24 + $0x4] sm:$0xf]  ;;  %s287_s30 = scalar_lea.vmem %s1144_s3, %s887_s21  ;;  %s290_s8 = scalar_lea.vmem %s1145_s4, %s1150_s19  ;;  %v912_v8 = vld [vmem:[%s273_s27 + $0x8] sm:$0xff]  }
  0x11   : > { %v905_v4 = vld [vmem:[%s273_s27] sm:$0xff]   ;;  %v326_v5 = vsel %vm321_vm1, %v313_v2, 0  ;;  %v372_v6 = vsel %vm321_vm1, %v314_v3, 0  ;;  %v910_v15 = vunpack.c.l.bf16 %v912_v8  ;;  %v315_v16 = vld [vmem:[%s278_s24 + $0x8] sm:$0xf]  ;;  %v911_v18 = vunpack.c.h.bf16 %v912_v8  ;;  %s283_s11 = scalar_lea.vmem %s1143_s2, %s1060_s20  ;;  %s295_s14 = scalar_lea.vmem %s1146_s5, %s1060_s20 }
  0x12   : > { %v906_v7 = vunpack.c.l.bf16 %v905_v4  ;;  %v907_v9 = vunpack.c.h.bf16 %v905_v4  ;;  %v506_v10 = vld [vmem:[%s287_s30] sm:$0xff]  ;;  %930 = vmatpush3.bf16.xpose.msra.mxu0 %v326_v5  ;;  %936 = vmatpush3.bf16.xpose.msra.mxu1 %v372_v6  ;;  %v316_v17 = vld [vmem:[%s278_s24 + $0xc] sm:$0xf]  ;;  %v418_v22 = vsel %vm321_vm1, %v315_v16, 0 }
  0x13   : > { %vm507_vm2 = vcmp.gt.f32.partialorder %v506_v10, 0.5  ;;  %v508_v11 = vld [vmem:[%s290_s8] sm:$0x1]  ;;  %941 = vmatprep.subr.bf16.mxu0 %v1013_v0  ;;  %947 = vmatprep.subr.bf16.mxu1 %v1013_v0  ;;  %v464_v23 = vsel %vm321_vm1, %v316_v17, 0  ;;  %v307_v24 = vmul.f32 0.35355338, %v910_v15 }
  0x14   : > { %v305_v12 = vmul.f32 0.35355338, %v906_v7  ;;  %v306_v13 = vmul.f32 0.35355338, %v907_v9  ;;  %v510_v14 = vsel %vm507_vm2, 1, %v1015_v1  ;;  %vm509_vm3 = vcmp.gt.f32.partialorder %v508_v11, 0.5 }
  0x15   : > { %512 = vperm.xlu0 %988, %v510_v14   ;;  %v515_v21 = vsel %vm509_vm3, 1, %v1015_v1  ;;  %v308_v25 = vmul.f32 0.35355338, %v911_v18  ;;  %v311_v26 = vpack.c.bf16 %v307_v24, %v307_v24  ;;  %v317_v16 = vld [vmem:[%s283_s11] sm:$0xf] }
  0x16   : > { %v309_v19 = vpack.c.bf16 %v305_v12, %v305_v12  ;;  %v310_v20 = vpack.c.bf16 %v306_v13, %v306_v13  ;;  %v519_v31 = vrot.slane %v515_v21, %v518_v30  ;;  %v587_v17 = vsel %vm585_vm9, %v317_v16, 0  ;;  %v318_v18 = vld [vmem:[%s283_s11 + $0x4] sm:$0xf] }
  0x17   : > { %v312_v27 = vpack.c.bf16 %v308_v25, %v308_v25 }
  0x18   : > { %vm520_vm4 = vcmp.eq.s32.totalorder %v519_v31, 1 }
  0x19   : > { %932 = vmatmul.mubr.msk.bf16.vlgmr.msra.gmra.mrb[0].mxu0 %vm321_vm1, %v309_v19  ;;  %938 = vmatmul.mubr.msk.bf16.vlgmr.msra.gmra.mrb[0].mxu1 %vm321_vm1, %v310_v20  ;;  %v633_v19 = vsel %vm585_vm9, %v318_v18, 0  ;;  %v319_v20 = vld [vmem:[%s283_s11 + $0x8] sm:$0xf] }
  0x1a   : > { %942 = vmatpush3.bf16.xpose.msra.mxu0 %v418_v22  ;;  %948 = vmatpush3.bf16.xpose.msra.mxu1 %v464_v23  ;;  %v679_v21 = vsel %vm585_vm9, %v319_v20, 0  ;;  %v320_v22 = vld [vmem:[%s283_s11 + $0xc] sm:$0xf] }
  0x1b   : > { %943 = vmatprep.mubr.msk.bf16.mxu0 %vm1014_vm0, %v1013_v0  ;;  %949 = vmatprep.mubr.msk.bf16.mxu1 %vm1014_vm0, %v1013_v0  ;;  %v725_v23 = vsel %vm585_vm9, %v320_v22, 0 }
  0x1c   : > { %953 = vmatprep.subr.bf16.mxu0 %v1013_v0  ;;  %959 = vmatprep.subr.bf16.mxu1 %v1013_v0 }
  0x21   : > { %944 = vmatmul.mubr.msk.bf16.vlgmr.msra.gmra.mrb[4].mxu0 %vm321_vm1, %v311_v26  ;;  %950 = vmatmul.mubr.msk.bf16.vlgmr.msra.gmra.mrb[4].mxu1 %vm321_vm1, %v312_v27 }
  0x22   : > { %955 = vmatprep.mubr.msk.bf16.mxu0 %vm1014_vm0, %v1013_v0  ;;  %961 = vmatprep.mubr.msk.bf16.mxu1 %vm1014_vm0, %v1013_v0 }
  0x23   : > { %954 = vmatpush3.bf16.msra.mxu0 %v587_v17  ;;  %960 = vmatpush3.bf16.msra.mxu1 %v633_v19 }
  0x24   : > { %965 = vmatprep.subr.bf16.mxu0 %v1013_v0  ;;  %971 = vmatprep.subr.bf16.mxu1 %v1013_v0 }
  0x94   : > { %v513_v32 = vpop.permute.xlu0 %512 }
  0x95   : > { %vm514_vm5 = vcmp.eq.s32.totalorder %v513_v32, 1 }
  0x96   : > { %vm521_vm7 = vmand %vm514_vm5, %vm520_vm4 }
  0x97   : > { %vm1096_vm8 = vmand %vm521_vm7, %vm526_vm6 }
  0xec   : > { %v362_v35 = vpop.f32.mrb[0].mxu0  ;;  %v408_v36 = vpop.f32.mrb[0].mxu1 }
  0xed   : > { %v530_v37 = vsel %vm1096_vm8, %v362_v35, -10000.0  ;;  %v531_v38 = vsel %vm1096_vm8, %v408_v36, -10000.0  ;;  %v933_v39 = vpop.f32.mrb[1].mxu0  ;;  %v939_v40 = vpop.f32.mrb[1].mxu1 }
  0xee   : > { %v365_v41 = vpop.f32.mrb[2].mxu0  ;;  %v537_v42 = vsel %vm321_vm1, %v531_v38, -inf  ;;  %v534_v43 = vsel %vm321_vm1, %v530_v37, -inf  ;;  %v411_v44 = vpop.f32.mrb[2].mxu1 }
  0xef   : > { %538 = vmax.xlane.f32.xlu1 %v537_v42  ;;  %535 = vmax.xlane.f32.xlu0 %v534_v43  ;;  %v934_v45 = vpop.f32.mrb[3].mxu0  ;;  %v940_v46 = vpop.f32.mrb[3].mxu1 }
  0xf4   : > { %v454_v47 = vpop.f32.mrb[4].mxu0  ;;  %v500_v48 = vpop.f32.mrb[4].mxu1 }
  0xf5   : > { %v532_v49 = vsel %vm1096_vm8, %v454_v47, -10000.0  ;;  %v533_v50 = vsel %vm1096_vm8, %v500_v48, -10000.0  ;;  %v945_v51 = vpop.f32.mrb[5].mxu0  ;;  %v951_v52 = vpop.f32.mrb[5].mxu1 }
  0xf6   : > { %v457_v53 = vpop.f32.mrb[6].mxu0  ;;  %v540_v54 = vsel %vm321_vm1, %v532_v49, -inf  ;;  %v503_v55 = vpop.f32.mrb[6].mxu1  ;;  %v543_v58 = vsel %vm321_vm1, %v533_v50, -inf }
  0xf7   : > { %541 = vmax.xlane.f32.xlu1 %v540_v54  ;;  %v946_v56 = vpop.f32.mrb[7].mxu0  ;;  %v952_v57 = vpop.f32.mrb[7].mxu1 }
  0xfb   : > { %544 = vmax.xlane.f32.xlu1 %v543_v58 }
 0x17c   : > { %v539_v59 = vpop.xlane.xlu1 %538  ;;  %v536_v60 = vpop.xlane.xlu0 %535 }
 0x17d   : > { %v547_v61 = vsub.f32 %v531_v38, %v539_v59  ;;  %v546_v62 = vsub.f32 %v530_v37, %v536_v60 }
 0x17f   : > { %v550_v63 = vmul.f32 1.442695, %v546_v62  ;;  %v552_v1 = vmul.f32 1.442695, %v547_v61 }
 0x181   : > { %989 = vpow2.f32 %v550_v63 }
 0x182   : > { %991 = vpow2.f32 %v552_v1 }
 0x184   : > { %v542_v2 = vpop.xlane.xlu1 %541 }
 0x185   : > { %v548_v3 = vsub.f32 %v532_v49, %v542_v2 }
 0x187   : > { %v554_v4 = vmul.f32 1.442695, %v548_v3 }
 0x188   : > { %v545_v5 = vpop.xlane.xlu1 %544 }
 0x189   : > { %993 = vpow2.f32 %v554_v4  ;;  %v549_v6 = vsub.f32 %v533_v50, %v545_v5 }
 0x18b   : > { %v556_v7 = vmul.f32 1.442695, %v549_v6  ;;  %v990_v8 = vpop.eup %989 }
 0x18c   : > { %v558_v9 = vsel %vm321_vm1, %v990_v8, 0.0  ;;  %v992_v10 = vpop.eup %991 }
 0x18d   : > { %995 = vpow2.f32 %v556_v7  ;;  %559 = vadd.xlane.f32.xlu1 %v558_v9  ;;  %v561_v11 = vsel %vm321_vm1, %v992_v10, 0.0 }
 0x191   : > { %562 = vadd.xlane.f32.xlu1 %v561_v11 }
 0x193   : > { %v994_v12 = vpop.eup %993 }
 0x194   : > { %v564_v13 = vsel %vm321_vm1, %v994_v12, 0.0 }
 0x195   : > { %565 = vadd.xlane.f32.xlu1 %v564_v13 }
 0x197   : > { %v996_v14 = vpop.eup %995 }
 0x198   : > { %v567_v15 = vsel %vm321_vm1, %v996_v14, 0.0 }
 0x199   : > { %568 = vadd.xlane.f32.xlu1 %v567_v15 }
 0x21a   : > { %v560_v24 = vpop.xlane.xlu1 %559 }
 0x21b   : > { %997 = vrcp.f32 %v560_v24 }
 0x21e   : > { %v563_v25 = vpop.xlane.xlu1 %562 }
 0x21f   : > { %999 = vrcp.f32 %v563_v25 }
 0x222   : > { %v566_v26 = vpop.xlane.xlu1 %565 }
 0x223   : > { %1001 = vrcp.f32 %v566_v26 }
 0x225   : > { %v998_v27 = vpop.eup %997 }
 0x226   : > { %v574_v28 = vmul.f32 %v998_v27, %v990_v8  ;;  %v569_v29 = vpop.xlane.xlu1 %568 }
 0x227   : > { %1003 = vrcp.f32 %v569_v29 }
 0x228   : > { %v578_v30 = vpack.c.bf16 %v574_v28, %v574_v28 }
 0x229   : > { %v1000_v31 = vpop.eup %999 }
 0x22a   : > { %v575_v32 = vmul.f32 %v1000_v31, %v992_v10  ;;  %956 = vmatmul.mubr.msk.bf16.vlgmr.msra.gmra.mrb[8].mxu0 %vm321_vm1, %v578_v30 }
 0x22b   : > { %966 = vmatpush3.bf16.msra.mxu0 %v679_v21  ;;  %967 = vmatprep.mubr.msk.bf16.mxu0 %vm1014_vm0, %v1013_v0 }
 0x22c   : > { %v579_v33 = vpack.c.bf16 %v575_v32, %v575_v32 }
 0x22d   : > { %v1002_v34 = vpop.eup %1001 }
 0x22e   : > { %v576_v35 = vmul.f32 %v1002_v34, %v994_v12  ;;  %962 = vmatmul.mubr.msk.bf16.vlgmr.msra.gmra.mrb[8].mxu1 %vm321_vm1, %v579_v33 }
 0x22f   : > { %972 = vmatpush3.bf16.msra.mxu1 %v725_v23  ;;  %973 = vmatprep.mubr.msk.bf16.mxu1 %vm1014_vm0, %v1013_v0 }
 0x230   : > { %v580_v36 = vpack.c.bf16 %v576_v35, %v576_v35 }
 0x231   : > { %v1004_v37 = vpop.eup %1003 }
 0x232   : > { %v577_v38 = vmul.f32 %v1004_v37, %v996_v14  ;;  %968 = vmatmul.mubr.msk.bf16.vlgmr.msra.gmra.mrb[12].mxu0 %vm321_vm1, %v580_v36 }
 0x234   : > { %v581_v39 = vpack.c.bf16 %v577_v38, %v577_v38 }
 0x236   : > { %974 = vmatmul.mubr.msk.bf16.vlgmr.msra.gmra.mrb[12].mxu1 %vm321_vm1, %v581_v39 }
 0x2fd   : > { %v623_v40 = vpop.f32.mrb[8].mxu0 }
 0x2fe   : > { %v767_v41 = vpack.c.bf16 %v623_v40, %v623_v40  ;;  %v957_v42 = vpop.f32.mrb[9].mxu0 }
 0x2ff   : > { %v626_v43 = vpop.f32.mrb[10].mxu0 }
 0x300   : > { %772 = vst.msk [vmem:[%s295_s14] sm:$0xf] %vm771_vm10, %v767_v41  ;;  %v958_v0 = vpop.f32.mrb[11].mxu0 }
 0x301   : > { %v669_v44 = vpop.f32.mrb[8].mxu1 }
 0x302   : > { %v768_v45 = vpack.c.bf16 %v669_v44, %v669_v44  ;;  %v963_v46 = vpop.f32.mrb[9].mxu1 }
 0x303   : > { %v672_v47 = vpop.f32.mrb[10].mxu1 }
 0x304   : > { %773 = vst.msk [vmem:[%s295_s14 + $0x4] sm:$0xf] %vm771_vm10, %v768_v45  ;;  %v964_v48 = vpop.f32.mrb[11].mxu1 }
 0x305   : > { %v715_v49 = vpop.f32.mrb[12].mxu0 }
 0x306   : > { %v769_v50 = vpack.c.bf16 %v715_v49, %v715_v49  ;;  %v969_v51 = vpop.f32.mrb[13].mxu0 }
 0x307   : > { %v718_v52 = vpop.f32.mrb[14].mxu0 }
 0x308   : > { %774 = vst.msk [vmem:[%s295_s14 + $0x8] sm:$0xf] %vm771_vm10, %v769_v50  ;;  %v970_v53 = vpop.f32.mrb[15].mxu0 }
 0x309   : > { %v761_v54 = vpop.f32.mrb[12].mxu1 }
 0x30a   : > { %v770_v55 = vpack.c.bf16 %v761_v54, %v761_v54  ;;  %v975_v56 = vpop.f32.mrb[13].mxu1 }
 0x30b   : > { %v764_v57 = vpop.f32.mrb[14].mxu1 }
 0x30c   : > { %775 = vst.msk [vmem:[%s295_s14 + $0xc] sm:$0xf] %vm771_vm10, %v770_v55  ;;  %v976_v58 = vpop.f32.mrb[15].mxu1 }
 0x30d PF: > { %s15_s18 = sadd.s32 1, %s1011_s18  }
 0x30e   : > { %p12_p4 = scmp.ge.s32.totalorder %s15_s18, 4  }
 0x310   :  { %14 = sbr.rel (!%p12_p4) target bundleno = 1 (0x1), region = 82 }

</bundles_post_ra>
